<compile_context>
chip_gen: v5e
topology: v5e:2x2
jax: 0.10.0
libtpu: 0.0.40
codegen_flags: <defaults>
</compile_context>

<pallas_src>
import functools

import numpy as np
import jax
import jax.numpy as jnp
from jax import lax
from jax.experimental import pallas as pl
from jax.experimental.pallas import tpu as pltpu


# ---------------------------------------------------------------------------
# Pallas kernel: one grid step = `block_b` batch elements, full (T, E) in VMEM.
# ---------------------------------------------------------------------------
def mha_kernel(x_ref, wq_ref, wk_ref, wv_ref, wo_ref, out_ref, o_scratch,
               *, head_num, head_dim):
    Bb, T, E = x_ref.shape
    rows = Bb * T

    # Flatten (Bb, T) so the three projections present `rows` rows to the MXU.
    xb = x_ref[...].reshape(rows, E).astype(jnp.bfloat16)

    # Full-width (K = E) QKV projections; bf16 inputs, f32 MXU accumulation.
    # sqrt(head_dim) scale (the original code MULTIPLIES) is folded into wq.
    # Cast to bf16 ONCE here: halves q/k/v VMEM and removes 3*H per-head casts.
    q = jnp.dot(xb, wq_ref[...], preferred_element_type=jnp.float32).astype(jnp.bfloat16)
    k = jnp.dot(xb, wk_ref[...], preferred_element_type=jnp.float32).astype(jnp.bfloat16)
    v = jnp.dot(xb, wv_ref[...], preferred_element_type=jnp.float32).astype(jnp.bfloat16)

    # Per-head attention, statically unrolled; each head is batched over Bb via
    # a single LEADING batch dim in dot_general (the batched-matmul form Mosaic
    # lowers reliably).
    # TODO(synk): process heads in lane-aligned 128-wide pairs with a size-2
    # head batch dim once Mosaic's dot_general supports a second / non-leading
    # batch dimension; with head_dim < 128 the odd-head slices below still pay
    # an XLU lane-relayout.
    for h in range(head_num):
        c0 = h * head_dim
        qh = q[:, c0:c0 + head_dim].reshape(Bb, T, head_dim)
        kh = k[:, c0:c0 + head_dim].reshape(Bb, T, head_dim)
        vh = v[:, c0:c0 + head_dim].reshape(Bb, T, head_dim)

        # scores[b, i, j] = sum_d q[b, i, d] * k[b, j, d]   (scale pre-folded)
        s = lax.dot_general(qh, kh, (((2,), (2,)), ((0,), (0,))),
                            preferred_element_type=jnp.float32)      # (Bb, T, T)
        # f32 softmax; keep max-subtraction (scores are *multiplied* by
        # sqrt(head_dim), so they are larger than usual).  exp + approx
        # reciprocal run on the EUP slot -> essentially free next to the MXU.
        s = s - jnp.max(s, axis=-1, keepdims=True)
        p = jnp.exp(s)
        inv = pl.reciprocal(jnp.sum(p, axis=-1, keepdims=True), approx=True)
        p = (p * inv).astype(jnp.bfloat16)

        # out[b, i, d] = sum_j attn[b, i, j] * v[b, j, d]
        oh = lax.dot_general(p, vh, (((2,), (1,)), ((0,), (0,))),
                             preferred_element_type=jnp.float32)     # (Bb, T, Dh)

        # Direct write into the bf16 concat scratch (replaces jnp.concatenate
        # of H temporaries); head-major columns realize 'b h t d -> b t (h d)'.
        o_scratch[:, c0:c0 + head_dim] = (
            oh.reshape(rows, head_dim).astype(jnp.bfloat16))

    # Single full-K (K = E) output projection straight from the scratch.
    out = jnp.dot(o_scratch[...], wo_ref[...], preferred_element_type=jnp.float32)
    out_ref[...] = out.reshape(Bb, T, E).astype(out_ref.dtype)

    # TODO(synk): optional `mask` argument (masked_fill with -inf) not
    # implemented; this kernel reproduces the module's default mask=None path.
    # TODO(synk): for T >~ 512 switch to a KV-blocked online softmax so the
    # (T, T) f32 score tile never materializes (needed for v7x's 64 MiB VMEM
    # without shrinking block_b below MXU-efficient sizes).


# ---------------------------------------------------------------------------
# Host-side (one-time) weight preparation: transpose, head-major permutation,
# scale folding, bf16 cast.  Done in numpy so no per-call gather is emitted.
# ---------------------------------------------------------------------------
def prepare_weights(wqkv, wo, head_num, dtype=jnp.bfloat16):
    wqkv_np = np.asarray(wqkv, dtype=np.float32)     # (3E, E) PyTorch layout
    wo_np = np.asarray(wo, dtype=np.float32)         # (E, E)
    E = wqkv_np.shape[1]
    head_dim = E // head_num
    scale = float(head_dim ** 0.5)                   # original code MULTIPLIES

    wqkv_t = wqkv_np.T                               # (E, 3E): y = x @ W.T

    # rearrange 'b t (d k h) -> k b h t d': flat column c = (d*3 + k)*H + h.
    # Build head-major (h outer, d inner) column permutations per k so the
    # kernel's per-head slices are contiguous and '(h d)' concat matches
    # rearrange 'b h t d -> b t (h d)'.
    def perm(k_idx):
        return np.array([(d * 3 + k_idx) * head_num + h
                         for h in range(head_num) for d in range(head_dim)],
                        dtype=np.int64)

    wq = wqkv_t[:, perm(0)] * scale                  # fold sqrt(head_dim) into Wq
    wk = wqkv_t[:, perm(1)]
    wv = wqkv_t[:, perm(2)]
    wo_t = wo_np.T

    return (jnp.asarray(wq, dtype), jnp.asarray(wk, dtype),
            jnp.asarray(wv, dtype), jnp.asarray(wo_t, dtype))


# ---------------------------------------------------------------------------
# VMEM byte model + block_b heuristic (256-row MXU target, even grid for v7x)
# ---------------------------------------------------------------------------
def _vmem_bytes_estimate(block_b, T, E, head_dim, io_itemsize, weight_buffers):
    rows = block_b * T
    weights = weight_buffers * 4 * E * E * 2       # bf16 weight copies in VMEM
    io = 2 * rows * E * io_itemsize * 2            # x & out blocks, double-buffered
    qkv_bf16 = 3 * rows * E * 2                    # bf16 q, k, v
    qkv_f32 = rows * E * 4                         # transient f32 dot result
    scores = 2 * block_b * T * T * 4               # s and p (f32), one head live
    head_out = block_b * T * head_dim * 4          # f32 per-head PV result
    concat = rows * E * 2                          # bf16 head-output scratch
    proj = rows * E * 4                            # f32 wo result before cast
    return (weights + io + qkv_bf16 + qkv_f32 + scores + head_out
            + concat + proj)


def _choose_block_b(B, T, E, head_dim, io_itemsize, mxu_row_target, vmem_budget):
    divisors = [d for d in range(1, B + 1) if B % d == 0]
    row_budget = max(mxu_row_target, T)

    def fits(d):
        return _vmem_bytes_estimate(d, T, E, head_dim, io_itemsize, 1) <= vmem_budget

    ok = [d for d in divisors if d * T <= row_budget and fits(d)]
    if not ok:
        ok = [d for d in divisors if fits(d)] or [1]
    # Prefer a grid with >= 2 steps (ideally even) so v7x's two TensorCores
    # both get work under dimension_semantics=("parallel",).
    multi = [d for d in ok if B // d >= 2]
    even = [d for d in multi if (B // d) % 2 == 0]
    if even:
        return max(even)
    if multi:
        return max(multi)
    return max(ok)


# ---------------------------------------------------------------------------
# Wrapper: BlockSpec plumbing + pallas_call
# ---------------------------------------------------------------------------
def multi_head_attention(x, wq, wk, wv, wo_t, head_num, *,
                         block_b=None, mxu_row_target=256,
                         vmem_budget_bytes=40 * 1024 * 1024,
                         vmem_limit_bytes=None):
    B, T, E = x.shape
    head_dim = E // head_num
    io_itemsize = jnp.dtype(x.dtype).itemsize

    if block_b is None:
        block_b = _choose_block_b(B, T, E, head_dim, io_itemsize,
                                  mxu_row_target, vmem_budget_bytes)
    assert B % block_b == 0
    grid = (B // block_b,)

    if vmem_limit_bytes is None:
        # Computed default: above v5e's 16 MiB scoped default, below v7x's
        # 64 MiB physical VMEM (conservative estimate assumes double-buffered
        # weights in case the single-buffer fallback path is taken).
        est = _vmem_bytes_estimate(block_b, T, E, head_dim, io_itemsize, 2)
        vmem_limit_bytes = int(min(max(2 * est, 32 * 1024 * 1024),
                                   56 * 1024 * 1024))

    kernel = functools.partial(mha_kernel, head_num=head_num, head_dim=head_dim)

    def build(weight_pipeline_mode):
        def weight_spec():
            if weight_pipeline_mode is None:
                return pl.BlockSpec((E, E), lambda b: (0, 0))
            return pl.BlockSpec((E, E), lambda b: (0, 0),
                                pipeline_mode=weight_pipeline_mode)

        return pl.pallas_call(
            kernel,
            out_shape=jax.ShapeDtypeStruct((B, T, E), x.dtype),
            grid=grid,
            in_specs=[
                pl.BlockSpec((block_b, T, E), lambda b: (b, 0, 0)),   # x
                weight_spec(),                                        # wq (scaled)
                weight_spec(),                                        # wk
                weight_spec(),                                        # wv
                weight_spec(),                                        # wo^T
            ],
            out_specs=pl.BlockSpec((block_b, T, E), lambda b: (b, 0, 0)),
            scratch_shapes=[pltpu.VMEM((block_b * T, E), jnp.bfloat16)],
            compiler_params=pltpu.CompilerParams(
                # Independent batch blocks -> parallel (megacore sharding).
                dimension_semantics=("parallel",),
                vmem_limit_bytes=vmem_limit_bytes),
        )

    try:
        # Constant-index_map weights only need ONE VMEM buffer each; Buffered(1)
        # saves ~4*E^2*2 bytes of default double-buffer VMEM.
        return build(pl.Buffered(buffer_count=1))(x, wq, wk, wv, wo_t)
    except Exception:
        # Fallback for jax versions without BlockSpec.pipeline_mode / Buffered(1).
        return build(None)(x, wq, wk, wv, wo_t)


# ---------------------------------------------------------------------------
# Pure-JAX reference following the PyTorch module exactly (f32, for checking)
# ---------------------------------------------------------------------------
def reference(x, wqkv, wo, head_num):
    B, T, E = x.shape
    Dh = E // head_num
    dk = Dh ** 0.5

    qkv = x @ wqkv.T                                   # (B, T, 3E)
    qkv = qkv.reshape(B, T, Dh, 3, head_num)           # '(d k h)' factor order
    q = jnp.transpose(qkv[:, :, :, 0, :], (0, 3, 1, 2))  # b h t d
    k = jnp.transpose(qkv[:, :, :, 1, :], (0, 3, 1, 2))
    v = jnp.transpose(qkv[:, :, :, 2, :], (0, 3, 1, 2))

    energy = jnp.einsum("bhid,bhjd->bhij", q, k) * dk  # MULTIPLIED, as in source
    attn = jax.nn.softmax(energy, axis=-1)
    o = jnp.einsum("bhij,bhjd->bhid", attn, v)
    o = jnp.transpose(o, (0, 2, 1, 3)).reshape(B, T, E)  # b t (h d)
    return o @ wo.T


# ---------------------------------------------------------------------------
if __name__ == "__main__":
    B, T, E, H = 2, 8, 32, 4   # batch, seq, embedding_dim, head_num

    key = jax.random.PRNGKey(0)
    k1, k2, k3 = jax.random.split(key, 3)
    wqkv = 0.08 * jax.random.normal(k1, (3 * E, E), jnp.float32)
    wo = 0.08 * jax.random.normal(k2, (E, E), jnp.float32)
    x = jax.random.normal(k3, (B, T, E), jnp.float32)

    wq, wk, wv, wo_t = prepare_weights(wqkv, wo, head_num=H)

    out = multi_head_attention(x, wq, wk, wv, wo_t, head_num=H)
    out = jax.block_until_ready(out)

    ref = jax.block_until_ready(reference(x, wqkv, wo, head_num=H))
    np.testing.assert_allclose(np.asarray(out), np.asarray(ref),
                               rtol=5e-2, atol=2e-2)
    print("KERNEL_OK")
</pallas_src>

<mosaic_0001>
module attributes {stable_mosaic.version = 11 : i64} {
  func.func @mha_kernel(%arg0: i32, %arg1: memref<1x8x32xf32, #tpu.memory_space<vmem>>, %arg2: memref<32x32xbf16, #tpu.memory_space<vmem>>, %arg3: memref<32x32xbf16, #tpu.memory_space<vmem>>, %arg4: memref<32x32xbf16, #tpu.memory_space<vmem>>, %arg5: memref<32x32xbf16, #tpu.memory_space<vmem>>, %arg6: memref<1x8x32xf32, #tpu.memory_space<vmem>>, %arg7: memref<8x32xbf16, #tpu.memory_space<vmem>>) attributes {dimension_semantics = [#tpu.dimension_semantics<parallel>], iteration_bounds = array<i64: 2>, scalar_prefetch = 0 : i64, scratch_operands = 1 : i64, tpu.core_type = #tpu.core_type<tc>, window_params = [{transform_indices = @transform_0, window_bounds = array<i64: 1, 8, 32>}, {pipeline_mode = #tpu.pipeline_mode<synchronous>, transform_indices = @transform_1, window_bounds = array<i64: 32, 32>}, {pipeline_mode = #tpu.pipeline_mode<synchronous>, transform_indices = @transform_2, window_bounds = array<i64: 32, 32>}, {pipeline_mode = #tpu.pipeline_mode<synchronous>, transform_indices = @transform_3, window_bounds = array<i64: 32, 32>}, {pipeline_mode = #tpu.pipeline_mode<synchronous>, transform_indices = @transform_4, window_bounds = array<i64: 32, 32>}, {transform_indices = @transform_5, window_bounds = array<i64: 1, 8, 32>}]} {
    %c0 = arith.constant 0 : index
    %c0_0 = arith.constant 0 : index
    %c0_1 = arith.constant 0 : index
    %0 = vector.load %arg1[%c0, %c0_0, %c0_1] : memref<1x8x32xf32, #tpu.memory_space<vmem>>, vector<1x8x32xf32>
    %1 = vector.shape_cast %0 : vector<1x8x32xf32> to vector<8x32xf32>
    %2 = arith.truncf %1 : vector<8x32xf32> to vector<8x32xbf16>
    %c0_2 = arith.constant 0 : index
    %c0_3 = arith.constant 0 : index
    %3 = vector.load %arg2[%c0_2, %c0_3] : memref<32x32xbf16, #tpu.memory_space<vmem>>, vector<32x32xbf16>
    %cst = arith.constant dense<0.000000e+00> : vector<8x32xf32>
    %4 = tpu.matmul %2, %3, %cst {dimension_numbers = #tpu.dot_dimension_numbers<[1], [0], [0], [1], [0, 0, 1, 1], [], []>} : vector<8x32xbf16>, vector<32x32xbf16>, vector<8x32xf32> -> vector<8x32xf32>
    %5 = arith.truncf %4 : vector<8x32xf32> to vector<8x32xbf16>
    %c0_4 = arith.constant 0 : index
    %c0_5 = arith.constant 0 : index
    %6 = vector.load %arg3[%c0_4, %c0_5] : memref<32x32xbf16, #tpu.memory_space<vmem>>, vector<32x32xbf16>
    %cst_6 = arith.constant dense<0.000000e+00> : vector<8x32xf32>
    %7 = tpu.matmul %2, %6, %cst_6 {dimension_numbers = #tpu.dot_dimension_numbers<[1], [0], [0], [1], [0, 0, 1, 1], [], []>} : vector<8x32xbf16>, vector<32x32xbf16>, vector<8x32xf32> -> vector<8x32xf32>
    %8 = arith.truncf %7 : vector<8x32xf32> to vector<8x32xbf16>
    %c0_7 = arith.constant 0 : index
    %c0_8 = arith.constant 0 : index
    %9 = vector.load %arg4[%c0_7, %c0_8] : memref<32x32xbf16, #tpu.memory_space<vmem>>, vector<32x32xbf16>
    %cst_9 = arith.constant dense<0.000000e+00> : vector<8x32xf32>
    %10 = tpu.matmul %2, %9, %cst_9 {dimension_numbers = #tpu.dot_dimension_numbers<[1], [0], [0], [1], [0, 0, 1, 1], [], []>} : vector<8x32xbf16>, vector<32x32xbf16>, vector<8x32xf32> -> vector<8x32xf32>
    %11 = arith.truncf %10 : vector<8x32xf32> to vector<8x32xbf16>
    %12 = vector.extract_strided_slice %5 {offsets = [0, 0], sizes = [8, 8], strides = [1, 1]} : vector<8x32xbf16> to vector<8x8xbf16>
    %13 = vector.shape_cast %12 : vector<8x8xbf16> to vector<1x8x8xbf16>
    %14 = vector.extract_strided_slice %8 {offsets = [0, 0], sizes = [8, 8], strides = [1, 1]} : vector<8x32xbf16> to vector<8x8xbf16>
    %15 = vector.shape_cast %14 : vector<8x8xbf16> to vector<1x8x8xbf16>
    %16 = vector.extract_strided_slice %11 {offsets = [0, 0], sizes = [8, 8], strides = [1, 1]} : vector<8x32xbf16> to vector<8x8xbf16>
    %17 = vector.shape_cast %16 : vector<8x8xbf16> to vector<1x8x8xbf16>
    %cst_10 = arith.constant dense<0.000000e+00> : vector<1x8x8xf32>
    %18 = tpu.matmul %13, %15, %cst_10 {dimension_numbers = #tpu.dot_dimension_numbers<[2], [2], [1], [1], [0, 0, 0, 1, 1, 1], [0], [0]>} : vector<1x8x8xbf16>, vector<1x8x8xbf16>, vector<1x8x8xf32> -> vector<1x8x8xf32>
    %cst_11 = arith.constant dense<0xFF800000> : vector<1x8xf32>
    %19 = vector.multi_reduction <maximumf>, %18, %cst_11 [2] : vector<1x8x8xf32> to vector<1x8xf32>
    %20 = vector.shape_cast %19 : vector<1x8xf32> to vector<1x8x1xf32>
    %21 = vector.broadcast %20 : vector<1x8x1xf32> to vector<1x8x8xf32>
    %22 = arith.subf %18, %21 : vector<1x8x8xf32>
    %23 = math.exp %22 : vector<1x8x8xf32>
    %cst_12 = arith.constant dense<0.000000e+00> : vector<1x8xf32>
    %24 = vector.multi_reduction <add>, %23, %cst_12 [2] : vector<1x8x8xf32> to vector<1x8xf32>
    %25 = vector.shape_cast %24 : vector<1x8xf32> to vector<1x8x1xf32>
    %26 = tpu.reciprocal %25 {approx = true} : vector<1x8x1xf32> -> vector<1x8x1xf32>
    %27 = vector.broadcast %26 : vector<1x8x1xf32> to vector<1x8x8xf32>
    %28 = arith.mulf %23, %27 : vector<1x8x8xf32>
    %29 = arith.truncf %28 : vector<1x8x8xf32> to vector<1x8x8xbf16>
    %cst_13 = arith.constant dense<0.000000e+00> : vector<1x8x8xf32>
    %30 = tpu.matmul %29, %17, %cst_13 {dimension_numbers = #tpu.dot_dimension_numbers<[2], [1], [1], [2], [0, 0, 0, 1, 1, 2], [0], [0]>} : vector<1x8x8xbf16>, vector<1x8x8xbf16>, vector<1x8x8xf32> -> vector<1x8x8xf32>
    %31 = vector.shape_cast %30 : vector<1x8x8xf32> to vector<8x8xf32>
    %32 = arith.truncf %31 : vector<8x8xf32> to vector<8x8xbf16>
    %c0_14 = arith.constant 0 : index
    %c0_15 = arith.constant 0 : index
    %33 = vector.load %arg7[%c0_14, %c0_15] : memref<8x32xbf16, #tpu.memory_space<vmem>>, vector<8x8xbf16>
    tpu.vector_store %arg7[%c0_14, %c0_15], %32 {strides = array<i32>} : memref<8x32xbf16, #tpu.memory_space<vmem>>, vector<8x8xbf16>,
    %34 = vector.extract_strided_slice %5 {offsets = [0, 8], sizes = [8, 8], strides = [1, 1]} : vector<8x32xbf16> to vector<8x8xbf16>
    %35 = vector.shape_cast %34 : vector<8x8xbf16> to vector<1x8x8xbf16>
    %36 = vector.extract_strided_slice %8 {offsets = [0, 8], sizes = [8, 8], strides = [1, 1]} : vector<8x32xbf16> to vector<8x8xbf16>
    %37 = vector.shape_cast %36 : vector<8x8xbf16> to vector<1x8x8xbf16>
    %38 = vector.extract_strided_slice %11 {offsets = [0, 8], sizes = [8, 8], strides = [1, 1]} : vector<8x32xbf16> to vector<8x8xbf16>
    %39 = vector.shape_cast %38 : vector<8x8xbf16> to vector<1x8x8xbf16>
    %cst_16 = arith.constant dense<0.000000e+00> : vector<1x8x8xf32>
    %40 = tpu.matmul %35, %37, %cst_16 {dimension_numbers = #tpu.dot_dimension_numbers<[2], [2], [1], [1], [0, 0, 0, 1, 1, 1], [0], [0]>} : vector<1x8x8xbf16>, vector<1x8x8xbf16>, vector<1x8x8xf32> -> vector<1x8x8xf32>
    %cst_17 = arith.constant dense<0xFF800000> : vector<1x8xf32>
    %41 = vector.multi_reduction <maximumf>, %40, %cst_17 [2] : vector<1x8x8xf32> to vector<1x8xf32>
    %42 = vector.shape_cast %41 : vector<1x8xf32> to vector<1x8x1xf32>
    %43 = vector.broadcast %42 : vector<1x8x1xf32> to vector<1x8x8xf32>
    %44 = arith.subf %40, %43 : vector<1x8x8xf32>
    %45 = math.exp %44 : vector<1x8x8xf32>
    %cst_18 = arith.constant dense<0.000000e+00> : vector<1x8xf32>
    %46 = vector.multi_reduction <add>, %45, %cst_18 [2] : vector<1x8x8xf32> to vector<1x8xf32>
    %47 = vector.shape_cast %46 : vector<1x8xf32> to vector<1x8x1xf32>
    %48 = tpu.reciprocal %47 {approx = true} : vector<1x8x1xf32> -> vector<1x8x1xf32>
    %49 = vector.broadcast %48 : vector<1x8x1xf32> to vector<1x8x8xf32>
    %50 = arith.mulf %45, %49 : vector<1x8x8xf32>
    %51 = arith.truncf %50 : vector<1x8x8xf32> to vector<1x8x8xbf16>
    %cst_19 = arith.constant dense<0.000000e+00> : vector<1x8x8xf32>
    %52 = tpu.matmul %51, %39, %cst_19 {dimension_numbers = #tpu.dot_dimension_numbers<[2], [1], [1], [2], [0, 0, 0, 1, 1, 2], [0], [0]>} : vector<1x8x8xbf16>, vector<1x8x8xbf16>, vector<1x8x8xf32> -> vector<1x8x8xf32>
    %53 = vector.shape_cast %52 : vector<1x8x8xf32> to vector<8x8xf32>
    %54 = arith.truncf %53 : vector<8x8xf32> to vector<8x8xbf16>
    %c0_20 = arith.constant 0 : index
    %c8 = arith.constant 8 : index
    %55 = vector.load %arg7[%c0_20, %c8] : memref<8x32xbf16, #tpu.memory_space<vmem>>, vector<8x8xbf16>
    tpu.vector_store %arg7[%c0_20, %c8], %54 {strides = array<i32>} : memref<8x32xbf16, #tpu.memory_space<vmem>>, vector<8x8xbf16>,
    %56 = vector.extract_strided_slice %5 {offsets = [0, 16], sizes = [8, 8], strides = [1, 1]} : vector<8x32xbf16> to vector<8x8xbf16>
    %57 = vector.shape_cast %56 : vector<8x8xbf16> to vector<1x8x8xbf16>
    %58 = vector.extract_strided_slice %8 {offsets = [0, 16], sizes = [8, 8], strides = [1, 1]} : vector<8x32xbf16> to vector<8x8xbf16>
    %59 = vector.shape_cast %58 : vector<8x8xbf16> to vector<1x8x8xbf16>
    %60 = vector.extract_strided_slice %11 {offsets = [0, 16], sizes = [8, 8], strides = [1, 1]} : vector<8x32xbf16> to vector<8x8xbf16>
    %61 = vector.shape_cast %60 : vector<8x8xbf16> to vector<1x8x8xbf16>
    %cst_21 = arith.constant dense<0.000000e+00> : vector<1x8x8xf32>
    %62 = tpu.matmul %57, %59, %cst_21 {dimension_numbers = #tpu.dot_dimension_numbers<[2], [2], [1], [1], [0, 0, 0, 1, 1, 1], [0], [0]>} : vector<1x8x8xbf16>, vector<1x8x8xbf16>, vector<1x8x8xf32> -> vector<1x8x8xf32>
    %cst_22 = arith.constant dense<0xFF800000> : vector<1x8xf32>
    %63 = vector.multi_reduction <maximumf>, %62, %cst_22 [2] : vector<1x8x8xf32> to vector<1x8xf32>
    %64 = vector.shape_cast %63 : vector<1x8xf32> to vector<1x8x1xf32>
    %65 = vector.broadcast %64 : vector<1x8x1xf32> to vector<1x8x8xf32>
    %66 = arith.subf %62, %65 : vector<1x8x8xf32>
    %67 = math.exp %66 : vector<1x8x8xf32>
    %cst_23 = arith.constant dense<0.000000e+00> : vector<1x8xf32>
    %68 = vector.multi_reduction <add>, %67, %cst_23 [2] : vector<1x8x8xf32> to vector<1x8xf32>
    %69 = vector.shape_cast %68 : vector<1x8xf32> to vector<1x8x1xf32>
    %70 = tpu.reciprocal %69 {approx = true} : vector<1x8x1xf32> -> vector<1x8x1xf32>
    %71 = vector.broadcast %70 : vector<1x8x1xf32> to vector<1x8x8xf32>
    %72 = arith.mulf %67, %71 : vector<1x8x8xf32>
    %73 = arith.truncf %72 : vector<1x8x8xf32> to vector<1x8x8xbf16>
    %cst_24 = arith.constant dense<0.000000e+00> : vector<1x8x8xf32>
    %74 = tpu.matmul %73, %61, %cst_24 {dimension_numbers = #tpu.dot_dimension_numbers<[2], [1], [1], [2], [0, 0, 0, 1, 1, 2], [0], [0]>} : vector<1x8x8xbf16>, vector<1x8x8xbf16>, vector<1x8x8xf32> -> vector<1x8x8xf32>
    %75 = vector.shape_cast %74 : vector<1x8x8xf32> to vector<8x8xf32>
    %76 = arith.truncf %75 : vector<8x8xf32> to vector<8x8xbf16>
    %c0_25 = arith.constant 0 : index
    %c16 = arith.constant 16 : index
    %77 = vector.load %arg7[%c0_25, %c16] : memref<8x32xbf16, #tpu.memory_space<vmem>>, vector<8x8xbf16>
    tpu.vector_store %arg7[%c0_25, %c16], %76 {strides = array<i32>} : memref<8x32xbf16, #tpu.memory_space<vmem>>, vector<8x8xbf16>,
    %78 = vector.extract_strided_slice %5 {offsets = [0, 24], sizes = [8, 8], strides = [1, 1]} : vector<8x32xbf16> to vector<8x8xbf16>
    %79 = vector.shape_cast %78 : vector<8x8xbf16> to vector<1x8x8xbf16>
    %80 = vector.extract_strided_slice %8 {offsets = [0, 24], sizes = [8, 8], strides = [1, 1]} : vector<8x32xbf16> to vector<8x8xbf16>
    %81 = vector.shape_cast %80 : vector<8x8xbf16> to vector<1x8x8xbf16>
    %82 = vector.extract_strided_slice %11 {offsets = [0, 24], sizes = [8, 8], strides = [1, 1]} : vector<8x32xbf16> to vector<8x8xbf16>
    %83 = vector.shape_cast %82 : vector<8x8xbf16> to vector<1x8x8xbf16>
    %cst_26 = arith.constant dense<0.000000e+00> : vector<1x8x8xf32>
    %84 = tpu.matmul %79, %81, %cst_26 {dimension_numbers = #tpu.dot_dimension_numbers<[2], [2], [1], [1], [0, 0, 0, 1, 1, 1], [0], [0]>} : vector<1x8x8xbf16>, vector<1x8x8xbf16>, vector<1x8x8xf32> -> vector<1x8x8xf32>
    %cst_27 = arith.constant dense<0xFF800000> : vector<1x8xf32>
    %85 = vector.multi_reduction <maximumf>, %84, %cst_27 [2] : vector<1x8x8xf32> to vector<1x8xf32>
    %86 = vector.shape_cast %85 : vector<1x8xf32> to vector<1x8x1xf32>
    %87 = vector.broadcast %86 : vector<1x8x1xf32> to vector<1x8x8xf32>
    %88 = arith.subf %84, %87 : vector<1x8x8xf32>
    %89 = math.exp %88 : vector<1x8x8xf32>
    %cst_28 = arith.constant dense<0.000000e+00> : vector<1x8xf32>
    %90 = vector.multi_reduction <add>, %89, %cst_28 [2] : vector<1x8x8xf32> to vector<1x8xf32>
    %91 = vector.shape_cast %90 : vector<1x8xf32> to vector<1x8x1xf32>
    %92 = tpu.reciprocal %91 {approx = true} : vector<1x8x1xf32> -> vector<1x8x1xf32>
    %93 = vector.broadcast %92 : vector<1x8x1xf32> to vector<1x8x8xf32>
    %94 = arith.mulf %89, %93 : vector<1x8x8xf32>
    %95 = arith.truncf %94 : vector<1x8x8xf32> to vector<1x8x8xbf16>
    %cst_29 = arith.constant dense<0.000000e+00> : vector<1x8x8xf32>
    %96 = tpu.matmul %95, %83, %cst_29 {dimension_numbers = #tpu.dot_dimension_numbers<[2], [1], [1], [2], [0, 0, 0, 1, 1, 2], [0], [0]>} : vector<1x8x8xbf16>, vector<1x8x8xbf16>, vector<1x8x8xf32> -> vector<1x8x8xf32>
    %97 = vector.shape_cast %96 : vector<1x8x8xf32> to vector<8x8xf32>
    %98 = arith.truncf %97 : vector<8x8xf32> to vector<8x8xbf16>
    %c0_30 = arith.constant 0 : index
    %c24 = arith.constant 24 : index
    %99 = vector.load %arg7[%c0_30, %c24] : memref<8x32xbf16, #tpu.memory_space<vmem>>, vector<8x8xbf16>
    tpu.vector_store %arg7[%c0_30, %c24], %98 {strides = array<i32>} : memref<8x32xbf16, #tpu.memory_space<vmem>>, vector<8x8xbf16>,
    %c0_31 = arith.constant 0 : index
    %c0_32 = arith.constant 0 : index
    %100 = vector.load %arg7[%c0_31, %c0_32] : memref<8x32xbf16, #tpu.memory_space<vmem>>, vector<8x32xbf16>
    %c0_33 = arith.constant 0 : index
    %c0_34 = arith.constant 0 : index
    %101 = vector.load %arg5[%c0_33, %c0_34] : memref<32x32xbf16, #tpu.memory_space<vmem>>, vector<32x32xbf16>
    %cst_35 = arith.constant dense<0.000000e+00> : vector<8x32xf32>
    %102 = tpu.matmul %100, %101, %cst_35 {dimension_numbers = #tpu.dot_dimension_numbers<[1], [0], [0], [1], [0, 0, 1, 1], [], []>} : vector<8x32xbf16>, vector<32x32xbf16>, vector<8x32xf32> -> vector<8x32xf32>
    %103 = vector.shape_cast %102 : vector<8x32xf32> to vector<1x8x32xf32>
    %c0_36 = arith.constant 0 : index
    %c0_37 = arith.constant 0 : index
    %c0_38 = arith.constant 0 : index
    %104 = vector.load %arg6[%c0_36, %c0_37, %c0_38] : memref<1x8x32xf32, #tpu.memory_space<vmem>>, vector<1x8x32xf32>
    tpu.vector_store %arg6[%c0_36, %c0_37, %c0_38], %103 {strides = array<i32>} : memref<1x8x32xf32, #tpu.memory_space<vmem>>, vector<1x8x32xf32>,
    return
  }
  func.func @transform_0(%arg0: i32) -> (i32, i32, i32) {
    %c0_i32 = arith.constant 0 : i32
    %c0_i32_0 = arith.constant 0 : i32
    %c0_i32_1 = arith.constant 0 : i32
    return %arg0, %c0_i32, %c0_i32_0 : i32, i32, i32
  }
  func.func @transform_1(%arg0: i32) -> (i32, i32) {
    %c0_i32 = arith.constant 0 : i32
    %c0_i32_0 = arith.constant 0 : i32
    %c0_i32_1 = arith.constant 0 : i32
    return %c0_i32, %c0_i32_0 : i32, i32
  }
  func.func @transform_2(%arg0: i32) -> (i32, i32) {
    %c0_i32 = arith.constant 0 : i32
    %c0_i32_0 = arith.constant 0 : i32
    %c0_i32_1 = arith.constant 0 : i32
    return %c0_i32, %c0_i32_0 : i32, i32
  }
  func.func @transform_3(%arg0: i32) -> (i32, i32) {
    %c0_i32 = arith.constant 0 : i32
    %c0_i32_0 = arith.constant 0 : i32
    %c0_i32_1 = arith.constant 0 : i32
    return %c0_i32, %c0_i32_0 : i32, i32
  }
  func.func @transform_4(%arg0: i32) -> (i32, i32) {
    %c0_i32 = arith.constant 0 : i32
    %c0_i32_0 = arith.constant 0 : i32
    %c0_i32_1 = arith.constant 0 : i32
    return %c0_i32, %c0_i32_0 : i32, i32
  }
  func.func @transform_5(%arg0: i32) -> (i32, i32, i32) {
    %c0_i32 = arith.constant 0 : i32
    %c0_i32_0 = arith.constant 0 : i32
    %c0_i32_1 = arith.constant 0 : i32
    return %arg0, %c0_i32, %c0_i32_0 : i32, i32, i32
  }
}

module attributes {stable_mosaic.version = 11 : i64} {
  func.func @mha_kernel(%arg0: i32, %arg1: memref<1x8x32xf32, #tpu.memory_space<vmem>>, %arg2: memref<32x32xbf16, #tpu.memory_space<vmem>>, %arg3: memref<32x32xbf16, #tpu.memory_space<vmem>>, %arg4: memref<32x32xbf16, #tpu.memory_space<vmem>>, %arg5: memref<32x32xbf16, #tpu.memory_space<vmem>>, %arg6: memref<1x8x32xf32, #tpu.memory_space<vmem>>, %arg7: memref<8x32xbf16, #tpu.memory_space<vmem>>) attributes {dimension_semantics = [#tpu.dimension_semantics<parallel>], iteration_bounds = array<i64: 2>, scalar_prefetch = 0 : i64, scratch_operands = 1 : i64, tpu.core_type = #tpu.core_type<tc>, window_params = [{transform_indices = @transform_0, window_bounds = array<i64: 1, 8, 32>}, {pipeline_mode = #tpu.pipeline_mode<synchronous>, transform_indices = @transform_1, window_bounds = array<i64: 32, 32>}, {pipeline_mode = #tpu.pipeline_mode<synchronous>, transform_indices = @transform_2, window_bounds = array<i64: 32, 32>}, {pipeline_mode = #tpu.pipeline_mode<synchronous>, transform_indices = @transform_3, window_bounds = array<i64: 32, 32>}, {pipeline_mode = #tpu.pipeline_mode<synchronous>, transform_indices = @transform_4, window_bounds = array<i64: 32, 32>}, {transform_indices = @transform_5, window_bounds = array<i64: 1, 8, 32>}]} {
    %c0 = arith.constant 0 : index
    %c0_0 = arith.constant 0 : index
    %c0_1 = arith.constant 0 : index
    %0 = vector.load %arg1[%c0, %c0_0, %c0_1] : memref<1x8x32xf32, #tpu.memory_space<vmem>>, vector<1x8x32xf32>
    %1 = vector.shape_cast %0 : vector<1x8x32xf32> to vector<8x32xf32>
    %2 = arith.truncf %1 : vector<8x32xf32> to vector<8x32xbf16>
    %c0_2 = arith.constant 0 : index
    %c0_3 = arith.constant 0 : index
    %3 = vector.load %arg2[%c0_2, %c0_3] : memref<32x32xbf16, #tpu.memory_space<vmem>>, vector<32x32xbf16>
    %cst = arith.constant dense<0.000000e+00> : vector<8x32xf32>
    %4 = tpu.matmul %2, %3, %cst {dimension_numbers = #tpu.dot_dimension_numbers<[1], [0], [0], [1], [0, 0, 1, 1], [], []>} : vector<8x32xbf16>, vector<32x32xbf16>, vector<8x32xf32> -> vector<8x32xf32>
    %5 = arith.truncf %4 : vector<8x32xf32> to vector<8x32xbf16>
    %c0_4 = arith.constant 0 : index
    %c0_5 = arith.constant 0 : index
    %6 = vector.load %arg3[%c0_4, %c0_5] : memref<32x32xbf16, #tpu.memory_space<vmem>>, vector<32x32xbf16>
    %cst_6 = arith.constant dense<0.000000e+00> : vector<8x32xf32>
    %7 = tpu.matmul %2, %6, %cst_6 {dimension_numbers = #tpu.dot_dimension_numbers<[1], [0], [0], [1], [0, 0, 1, 1], [], []>} : vector<8x32xbf16>, vector<32x32xbf16>, vector<8x32xf32> -> vector<8x32xf32>
    %8 = arith.truncf %7 : vector<8x32xf32> to vector<8x32xbf16>
    %c0_7 = arith.constant 0 : index
    %c0_8 = arith.constant 0 : index
    %9 = vector.load %arg4[%c0_7, %c0_8] : memref<32x32xbf16, #tpu.memory_space<vmem>>, vector<32x32xbf16>
    %cst_9 = arith.constant dense<0.000000e+00> : vector<8x32xf32>
    %10 = tpu.matmul %2, %9, %cst_9 {dimension_numbers = #tpu.dot_dimension_numbers<[1], [0], [0], [1], [0, 0, 1, 1], [], []>} : vector<8x32xbf16>, vector<32x32xbf16>, vector<8x32xf32> -> vector<8x32xf32>
    %11 = arith.truncf %10 : vector<8x32xf32> to vector<8x32xbf16>
    %12 = vector.extract_strided_slice %5 {offsets = [0, 0], sizes = [8, 8], strides = [1, 1]} : vector<8x32xbf16> to vector<8x8xbf16>
    %13 = vector.shape_cast %12 : vector<8x8xbf16> to vector<1x8x8xbf16>
    %14 = vector.extract_strided_slice %8 {offsets = [0, 0], sizes = [8, 8], strides = [1, 1]} : vector<8x32xbf16> to vector<8x8xbf16>
    %15 = vector.shape_cast %14 : vector<8x8xbf16> to vector<1x8x8xbf16>
    %16 = vector.extract_strided_slice %11 {offsets = [0, 0], sizes = [8, 8], strides = [1, 1]} : vector<8x32xbf16> to vector<8x8xbf16>
    %17 = vector.shape_cast %16 : vector<8x8xbf16> to vector<1x8x8xbf16>
    %cst_10 = arith.constant dense<0.000000e+00> : vector<1x8x8xf32>
    %18 = tpu.matmul %13, %15, %cst_10 {dimension_numbers = #tpu.dot_dimension_numbers<[2], [2], [1], [1], [0, 0, 0, 1, 1, 1], [0], [0]>} : vector<1x8x8xbf16>, vector<1x8x8xbf16>, vector<1x8x8xf32> -> vector<1x8x8xf32>
    %cst_11 = arith.constant dense<0xFF800000> : vector<1x8xf32>
    %19 = vector.multi_reduction <maximumf>, %18, %cst_11 [2] : vector<1x8x8xf32> to vector<1x8xf32>
    %20 = vector.shape_cast %19 : vector<1x8xf32> to vector<1x8x1xf32>
    %21 = vector.broadcast %20 : vector<1x8x1xf32> to vector<1x8x8xf32>
    %22 = arith.subf %18, %21 : vector<1x8x8xf32>
    %23 = math.exp %22 : vector<1x8x8xf32>
    %cst_12 = arith.constant dense<0.000000e+00> : vector<1x8xf32>
    %24 = vector.multi_reduction <add>, %23, %cst_12 [2] : vector<1x8x8xf32> to vector<1x8xf32>
    %25 = vector.shape_cast %24 : vector<1x8xf32> to vector<1x8x1xf32>
    %26 = tpu.reciprocal %25 {approx = true} : vector<1x8x1xf32> -> vector<1x8x1xf32>
    %27 = vector.broadcast %26 : vector<1x8x1xf32> to vector<1x8x8xf32>
    %28 = arith.mulf %23, %27 : vector<1x8x8xf32>
    %29 = arith.truncf %28 : vector<1x8x8xf32> to vector<1x8x8xbf16>
    %cst_13 = arith.constant dense<0.000000e+00> : vector<1x8x8xf32>
    %30 = tpu.matmul %29, %17, %cst_13 {dimension_numbers = #tpu.dot_dimension_numbers<[2], [1], [1], [2], [0, 0, 0, 1, 1, 2], [0], [0]>} : vector<1x8x8xbf16>, vector<1x8x8xbf16>, vector<1x8x8xf32> -> vector<1x8x8xf32>
    %31 = vector.shape_cast %30 : vector<1x8x8xf32> to vector<8x8xf32>
    %32 = arith.truncf %31 : vector<8x8xf32> to vector<8x8xbf16>
    %c0_14 = arith.constant 0 : index
    %c0_15 = arith.constant 0 : index
    %33 = vector.load %arg7[%c0_14, %c0_15] : memref<8x32xbf16, #tpu.memory_space<vmem>>, vector<8x8xbf16>
    tpu.vector_store %arg7[%c0_14, %c0_15], %32 {strides = array<i32>} : memref<8x32xbf16, #tpu.memory_space<vmem>>, vector<8x8xbf16>,
    %34 = vector.extract_strided_slice %5 {offsets = [0, 8], sizes = [8, 8], strides = [1, 1]} : vector<8x32xbf16> to vector<8x8xbf16>
    %35 = vector.shape_cast %34 : vector<8x8xbf16> to vector<1x8x8xbf16>
    %36 = vector.extract_strided_slice %8 {offsets = [0, 8], sizes = [8, 8], strides = [1, 1]} : vector<8x32xbf16> to vector<8x8xbf16>
    %37 = vector.shape_cast %36 : vector<8x8xbf16> to vector<1x8x8xbf16>
    %38 = vector.extract_strided_slice %11 {offsets = [0, 8], sizes = [8, 8], strides = [1, 1]} : vector<8x32xbf16> to vector<8x8xbf16>
    %39 = vector.shape_cast %38 : vector<8x8xbf16> to vector<1x8x8xbf16>
    %cst_16 = arith.constant dense<0.000000e+00> : vector<1x8x8xf32>
    %40 = tpu.matmul %35, %37, %cst_16 {dimension_numbers = #tpu.dot_dimension_numbers<[2], [2], [1], [1], [0, 0, 0, 1, 1, 1], [0], [0]>} : vector<1x8x8xbf16>, vector<1x8x8xbf16>, vector<1x8x8xf32> -> vector<1x8x8xf32>
    %cst_17 = arith.constant dense<0xFF800000> : vector<1x8xf32>
    %41 = vector.multi_reduction <maximumf>, %40, %cst_17 [2] : vector<1x8x8xf32> to vector<1x8xf32>
    %42 = vector.shape_cast %41 : vector<1x8xf32> to vector<1x8x1xf32>
    %43 = vector.broadcast %42 : vector<1x8x1xf32> to vector<1x8x8xf32>
    %44 = arith.subf %40, %43 : vector<1x8x8xf32>
    %45 = math.exp %44 : vector<1x8x8xf32>
    %cst_18 = arith.constant dense<0.000000e+00> : vector<1x8xf32>
    %46 = vector.multi_reduction <add>, %45, %cst_18 [2] : vector<1x8x8xf32> to vector<1x8xf32>
    %47 = vector.shape_cast %46 : vector<1x8xf32> to vector<1x8x1xf32>
    %48 = tpu.reciprocal %47 {approx = true} : vector<1x8x1xf32> -> vector<1x8x1xf32>
    %49 = vector.broadcast %48 : vector<1x8x1xf32> to vector<1x8x8xf32>
    %50 = arith.mulf %45, %49 : vector<1x8x8xf32>
    %51 = arith.truncf %50 : vector<1x8x8xf32> to vector<1x8x8xbf16>
    %cst_19 = arith.constant dense<0.000000e+00> : vector<1x8x8xf32>
    %52 = tpu.matmul %51, %39, %cst_19 {dimension_numbers = #tpu.dot_dimension_numbers<[2], [1], [1], [2], [0, 0, 0, 1, 1, 2], [0], [0]>} : vector<1x8x8xbf16>, vector<1x8x8xbf16>, vector<1x8x8xf32> -> vector<1x8x8xf32>
    %53 = vector.shape_cast %52 : vector<1x8x8xf32> to vector<8x8xf32>
    %54 = arith.truncf %53 : vector<8x8xf32> to vector<8x8xbf16>
    %c0_20 = arith.constant 0 : index
    %c8 = arith.constant 8 : index
    %55 = vector.load %arg7[%c0_20, %c8] : memref<8x32xbf16, #tpu.memory_space<vmem>>, vector<8x8xbf16>
    tpu.vector_store %arg7[%c0_20, %c8], %54 {strides = array<i32>} : memref<8x32xbf16, #tpu.memory_space<vmem>>, vector<8x8xbf16>,
    %56 = vector.extract_strided_slice %5 {offsets = [0, 16], sizes = [8, 8], strides = [1, 1]} : vector<8x32xbf16> to vector<8x8xbf16>
    %57 = vector.shape_cast %56 : vector<8x8xbf16> to vector<1x8x8xbf16>
    %58 = vector.extract_strided_slice %8 {offsets = [0, 16], sizes = [8, 8], strides = [1, 1]} : vector<8x32xbf16> to vector<8x8xbf16>
    %59 = vector.shape_cast %58 : vector<8x8xbf16> to vector<1x8x8xbf16>
    %60 = vector.extract_strided_slice %11 {offsets = [0, 16], sizes = [8, 8], strides = [1, 1]} : vector<8x32xbf16> to vector<8x8xbf16>
    %61 = vector.shape_cast %60 : vector<8x8xbf16> to vector<1x8x8xbf16>
    %cst_21 = arith.constant dense<0.000000e+00> : vector<1x8x8xf32>
    %62 = tpu.matmul %57, %59, %cst_21 {dimension_numbers = #tpu.dot_dimension_numbers<[2], [2], [1], [1], [0, 0, 0, 1, 1, 1], [0], [0]>} : vector<1x8x8xbf16>, vector<1x8x8xbf16>, vector<1x8x8xf32> -> vector<1x8x8xf32>
    %cst_22 = arith.constant dense<0xFF800000> : vector<1x8xf32>
    %63 = vector.multi_reduction <maximumf>, %62, %cst_22 [2] : vector<1x8x8xf32> to vector<1x8xf32>
    %64 = vector.shape_cast %63 : vector<1x8xf32> to vector<1x8x1xf32>
    %65 = vector.broadcast %64 : vector<1x8x1xf32> to vector<1x8x8xf32>
    %66 = arith.subf %62, %65 : vector<1x8x8xf32>
    %67 = math.exp %66 : vector<1x8x8xf32>
    %cst_23 = arith.constant dense<0.000000e+00> : vector<1x8xf32>
    %68 = vector.multi_reduction <add>, %67, %cst_23 [2] : vector<1x8x8xf32> to vector<1x8xf32>
    %69 = vector.shape_cast %68 : vector<1x8xf32> to vector<1x8x1xf32>
    %70 = tpu.reciprocal %69 {approx = true} : vector<1x8x1xf32> -> vector<1x8x1xf32>
    %71 = vector.broadcast %70 : vector<1x8x1xf32> to vector<1x8x8xf32>
    %72 = arith.mulf %67, %71 : vector<1x8x8xf32>
    %73 = arith.truncf %72 : vector<1x8x8xf32> to vector<1x8x8xbf16>
    %cst_24 = arith.constant dense<0.000000e+00> : vector<1x8x8xf32>
    %74 = tpu.matmul %73, %61, %cst_24 {dimension_numbers = #tpu.dot_dimension_numbers<[2], [1], [1], [2], [0, 0, 0, 1, 1, 2], [0], [0]>} : vector<1x8x8xbf16>, vector<1x8x8xbf16>, vector<1x8x8xf32> -> vector<1x8x8xf32>
    %75 = vector.shape_cast %74 : vector<1x8x8xf32> to vector<8x8xf32>
    %76 = arith.truncf %75 : vector<8x8xf32> to vector<8x8xbf16>
    %c0_25 = arith.constant 0 : index
    %c16 = arith.constant 16 : index
    %77 = vector.load %arg7[%c0_25, %c16] : memref<8x32xbf16, #tpu.memory_space<vmem>>, vector<8x8xbf16>
    tpu.vector_store %arg7[%c0_25, %c16], %76 {strides = array<i32>} : memref<8x32xbf16, #tpu.memory_space<vmem>>, vector<8x8xbf16>,
    %78 = vector.extract_strided_slice %5 {offsets = [0, 24], sizes = [8, 8], strides = [1, 1]} : vector<8x32xbf16> to vector<8x8xbf16>
    %79 = vector.shape_cast %78 : vector<8x8xbf16> to vector<1x8x8xbf16>
    %80 = vector.extract_strided_slice %8 {offsets = [0, 24], sizes = [8, 8], strides = [1, 1]} : vector<8x32xbf16> to vector<8x8xbf16>
    %81 = vector.shape_cast %80 : vector<8x8xbf16> to vector<1x8x8xbf16>
    %82 = vector.extract_strided_slice %11 {offsets = [0, 24], sizes = [8, 8], strides = [1, 1]} : vector<8x32xbf16> to vector<8x8xbf16>
    %83 = vector.shape_cast %82 : vector<8x8xbf16> to vector<1x8x8xbf16>
    %cst_26 = arith.constant dense<0.000000e+00> : vector<1x8x8xf32>
    %84 = tpu.matmul %79, %81, %cst_26 {dimension_numbers = #tpu.dot_dimension_numbers<[2], [2], [1], [1], [0, 0, 0, 1, 1, 1], [0], [0]>} : vector<1x8x8xbf16>, vector<1x8x8xbf16>, vector<1x8x8xf32> -> vector<1x8x8xf32>
    %cst_27 = arith.constant dense<0xFF800000> : vector<1x8xf32>
    %85 = vector.multi_reduction <maximumf>, %84, %cst_27 [2] : vector<1x8x8xf32> to vector<1x8xf32>
    %86 = vector.shape_cast %85 : vector<1x8xf32> to vector<1x8x1xf32>
    %87 = vector.broadcast %86 : vector<1x8x1xf32> to vector<1x8x8xf32>
    %88 = arith.subf %84, %87 : vector<1x8x8xf32>
    %89 = math.exp %88 : vector<1x8x8xf32>
    %cst_28 = arith.constant dense<0.000000e+00> : vector<1x8xf32>
    %90 = vector.multi_reduction <add>, %89, %cst_28 [2] : vector<1x8x8xf32> to vector<1x8xf32>
    %91 = vector.shape_cast %90 : vector<1x8xf32> to vector<1x8x1xf32>
    %92 = tpu.reciprocal %91 {approx = true} : vector<1x8x1xf32> -> vector<1x8x1xf32>
    %93 = vector.broadcast %92 : vector<1x8x1xf32> to vector<1x8x8xf32>
    %94 = arith.mulf %89, %93 : vector<1x8x8xf32>
    %95 = arith.truncf %94 : vector<1x8x8xf32> to vector<1x8x8xbf16>
    %cst_29 = arith.constant dense<0.000000e+00> : vector<1x8x8xf32>
    %96 = tpu.matmul %95, %83, %cst_29 {dimension_numbers = #tpu.dot_dimension_numbers<[2], [1], [1], [2], [0, 0, 0, 1, 1, 2], [0], [0]>} : vector<1x8x8xbf16>, vector<1x8x8xbf16>, vector<1x8x8xf32> -> vector<1x8x8xf32>
    %97 = vector.shape_cast %96 : vector<1x8x8xf32> to vector<8x8xf32>
    %98 = arith.truncf %97 : vector<8x8xf32> to vector<8x8xbf16>
    %c0_30 = arith.constant 0 : index
    %c24 = arith.constant 24 : index
    %99 = vector.load %arg7[%c0_30, %c24] : memref<8x32xbf16, #tpu.memory_space<vmem>>, vector<8x8xbf16>
    tpu.vector_store %arg7[%c0_30, %c24], %98 {strides = array<i32>} : memref<8x32xbf16, #tpu.memory_space<vmem>>, vector<8x8xbf16>,
    %c0_31 = arith.constant 0 : index
    %c0_32 = arith.constant 0 : index
    %100 = vector.load %arg7[%c0_31, %c0_32] : memref<8x32xbf16, #tpu.memory_space<vmem>>, vector<8x32xbf16>
    %c0_33 = arith.constant 0 : index
    %c0_34 = arith.constant 0 : index
    %101 = vector.load %arg5[%c0_33, %c0_34] : memref<32x32xbf16, #tpu.memory_space<vmem>>, vector<32x32xbf16>
    %cst_35 = arith.constant dense<0.000000e+00> : vector<8x32xf32>
    %102 = tpu.matmul %100, %101, %cst_35 {dimension_numbers = #tpu.dot_dimension_numbers<[1], [0], [0], [1], [0, 0, 1, 1], [], []>} : vector<8x32xbf16>, vector<32x32xbf16>, vector<8x32xf32> -> vector<8x32xf32>
    %103 = vector.shape_cast %102 : vector<8x32xf32> to vector<1x8x32xf32>
    %c0_36 = arith.constant 0 : index
    %c0_37 = arith.constant 0 : index
    %c0_38 = arith.constant 0 : index
    %104 = vector.load %arg6[%c0_36, %c0_37, %c0_38] : memref<1x8x32xf32, #tpu.memory_space<vmem>>, vector<1x8x32xf32>
    tpu.vector_store %arg6[%c0_36, %c0_37, %c0_38], %103 {strides = array<i32>} : memref<1x8x32xf32, #tpu.memory_space<vmem>>, vector<1x8x32xf32>,
    return
  }
  func.func @transform_0(%arg0: i32) -> (i32, i32, i32) {
    %c0_i32 = arith.constant 0 : i32
    %c0_i32_0 = arith.constant 0 : i32
    %c0_i32_1 = arith.constant 0 : i32
    return %arg0, %c0_i32, %c0_i32_0 : i32, i32, i32
  }
  func.func @transform_1(%arg0: i32) -> (i32, i32) {
    %c0_i32 = arith.constant 0 : i32
    %c0_i32_0 = arith.constant 0 : i32
    %c0_i32_1 = arith.constant 0 : i32
    return %c0_i32, %c0_i32_0 : i32, i32
  }
  func.func @transform_2(%arg0: i32) -> (i32, i32) {
    %c0_i32 = arith.constant 0 : i32
    %c0_i32_0 = arith.constant 0 : i32
    %c0_i32_1 = arith.constant 0 : i32
    return %c0_i32, %c0_i32_0 : i32, i32
  }
  func.func @transform_3(%arg0: i32) -> (i32, i32) {
    %c0_i32 = arith.constant 0 : i32
    %c0_i32_0 = arith.constant 0 : i32
    %c0_i32_1 = arith.constant 0 : i32
    return %c0_i32, %c0_i32_0 : i32, i32
  }
  func.func @transform_4(%arg0: i32) -> (i32, i32) {
    %c0_i32 = arith.constant 0 : i32
    %c0_i32_0 = arith.constant 0 : i32
    %c0_i32_1 = arith.constant 0 : i32
    return %c0_i32, %c0_i32_0 : i32, i32
  }
  func.func @transform_5(%arg0: i32) -> (i32, i32, i32) {
    %c0_i32 = arith.constant 0 : i32
    %c0_i32_0 = arith.constant 0 : i32
    %c0_i32_1 = arith.constant 0 : i32
    return %arg0, %c0_i32, %c0_i32_0 : i32, i32, i32
  }
}

</mosaic_0001>

<bundles_post_ra>
// kernel: tpu_custom_call.1
= control target key start
LH: loop header
LB: loop body
LE: loop exit
PB: predicated region body
PF: predicated region fallthrough
CT: control target
= control target key end

     0   :  { %10 = vsyncpa [#allocation4], 0  ;;  %s1476_s0 = inlined_call_operand.hbm [shape: f32[2,8,32], index: 0, kind: input, shape index: {}]   ;;  %s1477_s1 = inlined_call_operand.hbm [shape: bf16[32,32], index: 1, kind: input, shape index: {}]   ;;  %s1478_s2 = inlined_call_operand.hbm [shape: bf16[32,32], index: 2, kind: input, shape index: {}]   ;;  %s1479_s3 = inlined_call_operand.hbm [shape: bf16[32,32], index: 3, kind: input, shape index: {}]   ;;  %s1480_s4 = inlined_call_operand.hbm [shape: bf16[32,32], index: 4, kind: input, shape index: {}]   ;;  %s1481_s5 = inlined_call_operand.hbm [shape: f32[2,8,32], index: 5, kind: output, shape index: {}]  }
   0x1   :  { %12 = vsyncpa [#allocation4 + $0x1], 0 }
   0x2   :  { %13 = vsyncpa [#allocation7], 0 }
   0x3   :  { %14 = vsyncpa [#allocation10], 0 }
   0x4   :  { %15 = vsyncpa [#allocation5], 0 }
   0x5   :  { %17 = vsyncpa [#allocation5 + $0x1], 0  ;;  %s1267_s18 = smov 0   ;;  %s1269_s19 = smov 0  }
   0x6   :  { %s1271_s20 = smov 0   ;;  %s1273_s21 = smov 0  }
   0x7 LB: > { %s175_s24 = sshll.u32 %s1477_s1, 4  ;;  %s1291_s25 = sadd.s32 4294967295, %s1223_s21   ;;  %s1223_s21 = sphi %s1273_s21, %s1493_s21   ;;  %s1219_s20 = sphi %s1271_s20, %s1492_s20   ;;  %s1215_s19 = sphi %s1269_s19, %s1491_s19   ;;  %s1211_s18 = sphi %s1267_s18, %s1490_s18   ;;  %s176_s24 = int_to_ptr.hbm [resolvable:$true] %s175_s24 }
   0x8   : > { %p817_p0 = scmp.ge.s32.totalorder %s1223_s21, 1  ;;  %p44_p1 = scmp.eq.s32.totalorder %s1291_s25, 0 }
   0x9   : > { %p164_p2 = scmp.lt.s32.totalorder %s1223_s21, 3  ;;  %s1225_s27 = smov [#allocation6]  }
   0xa   : > { %s177_s28 = sshll.u32 %s1225_s27, 4  ;;  %s203_s6 = sshll.u32 %s1479_s3, 4  ;;  %s178_s28 = int_to_ptr.vmem [resolvable:$true] %s177_s28  ;;  %s204_s6 = int_to_ptr.hbm [resolvable:$true] %s203_s6 }
   0xb   : > { %p1296_p3 = pnand %p817_p0, %p164_p2  ;;  %s189_s10 = sshll.u32 %s1478_s2, 4  ;;  %s190_s10 = int_to_ptr.hbm [resolvable:$true] %s189_s10 }
   0xc   : > { %s1226_s11 = smov [#allocation9]   ;;  %s1227_s13 = smov 64  }
   0xd   : > { %p908_p4 = pneg %p1296_p3  ;;  %s205_s12 = sshll.u32 %s1226_s11, 4  ;;  %s206_s12 = int_to_ptr.vmem [resolvable:$true] %s205_s12 }
   0xe   : > { %s1228_s14 = smov 4   ;;  %s217_s17 = sshll.u32 %s1480_s4, 4  ;;  %s218_s17 = int_to_ptr.hbm [resolvable:$true] %s217_s17 }
   0xf   : > { %p1308_p6 = pnand %p908_p4, %p44_p1  ;;  %s1229_s22 = smov [#allocation8]  }
  0x10   : > { %s191_s23 = sshll.u32 %s1229_s22, 4  ;;  %s1328_s29 = sadd.s32 1, %s1223_s21   ;;  %s192_s23 = int_to_ptr.vmem [resolvable:$true] %s191_s23 }
  0x11   : > { %911 = dma.hbm_to_vmem [thread:$0]  (!%p1308_p6), %s176_s24, 256, %s178_s28, [#allocation7], %s1227_s13, %s1227_s13, %s1228_s14  }
  0x12   : > { %917 = dma.hbm_to_vmem [thread:$0]  (!%p1308_p6), %s204_s6, 256, %s206_s12, [#allocation10], %s1227_s13, %s1227_s13, %s1228_s14  }
  0x13   : > { %914 = dma.hbm_to_vmem [thread:$0]  (!%p1308_p6), %s190_s10, 256, %s192_s23, [#allocation7], %s1227_s13, %s1227_s13, %s1228_s14  }
  0x14   : > { %s1230_s24 = smov [#allocation11]   ;;  %s816_s28 = sadd.s32 4294967294, %s1223_s21  }
  0x15   : > { %s219_s27 = sshll.u32 %s1230_s24, 4  ;;  %s27_s30 = ssub.s32 %s1223_s21, %s1328_s29  ;;  %s220_s27 = int_to_ptr.vmem [resolvable:$true] %s219_s27 }
  0x16   : > { %920 = dma.hbm_to_vmem [thread:$0]  (!%p1308_p6), %s218_s17, 256, %s220_s27, [#allocation10], %s1227_s13, %s1227_s13, %s1228_s14  }
  0x17   : > { %s30_s6 = sadd.s32 1, %s1219_s20  ;;  %p28_p7 = scmp.eq.s32.totalorder %s27_s30, 0 }
  0x18   : > { %p37_p8 = scmp.ne.s32.totalorder %s1219_s20, %s1215_s19  ;;  %p38_p9 = scmp.eq.s32.totalorder %s1223_s21, 0 }
  0x19   : > { %p43_p10 = scmp.ne.s32.totalorder %s1215_s19, %s1211_s18  ;;  %p151_p13 = scmp.eq.s32.totalorder %s1291_s25, 1 }
  0x1a   : > { %s1339_s8 = scalar_select %p28_p7, %s1219_s20, %s30_s6  }
  0x1b   : > { %p1341_p11 = por %p38_p9, %p37_p8  ;;  %p1347_p12 = por %p44_p1, %p43_p10 }
  0x1c   : > { %p157_p0 = scmp.eq.s32.totalorder %s816_s28, 1  ;;  %p933_p2 = scmp.lt.s32.totalorder %s1223_s21, 2 }
  0x1d   : > { %s233_s10 = sand.u32 1, %s1219_s20   ;;  %p1354_p4 = por %p151_p13, %p37_p8 }
  0x1e   : > { %p1358_p6 = por %p157_p0, %p43_p10  ;;  %s823_s13 = sshll.u32 %s233_s10, 3 }
  0x1f   : > { %s824_s14 = sshll.u32 %s1223_s21, 3  ;;  %s237_s22 = scalar_lea.vmem [#allocation3], %s823_s13 }
  0x20   : > { %s241_s17 = scalar_lea.hbm %s1476_s0, %s824_s14  ;;  %s245_s23 = sshll.u32 %s237_s22, 4  ;;  %s246_s23 = int_to_ptr.vmem [resolvable:$true] %s245_s23 }
  0x21   : > { %s243_s24 = sshll.u32 %s241_s17, 4  ;;  %p1368_p7 = pnand %p933_p2, %p1341_p11  ;;  %s244_s24 = int_to_ptr.hbm [resolvable:$true] %s243_s24 }
  0x22   : > { %s234_s28 = scalar_lea.sflag [#allocation4], %s233_s10  ;;  %s1119_s30 = sshra.s32 %s244_s24, 4  ;;  %s1120_s30 = int_to_ptr.hbm [resolvable:$true] %s1119_s30 }
  0x23   : > { %s1121_s6 = scalar_lea.hbm %s1120_s30, 8  ;;  %p1123_p9 = pneg %p1368_p7 }
  0x24   : > { %p1122_p8 = scmp.ne.s32.totalorder %s1120_s30, %s1121_s6  ;;  %s1126_s15 = scalar_lea.hbm %s1476_s0, 16 }
  0x25   : > { %p1127_p11 = scmp.lt.s32.totalorder %s1120_s30, %s1476_s0  ;;  %p1128_p0 = scmp.lt.s32.totalorder %s1126_s15, %s1121_s6 }
  0x26   : > { %p1124_p10 = pnand %p1123_p9, %p1122_p8 }
  0x27   : > { %p1129_p2 = por %p1128_p0, %p1127_p11 }
  0x28   : > { %p1125_p13 = pneg %p1124_p10 }
  0x2a   : > { %p1130_p5 = pnand %p1129_p2, %p1125_p13 }
  0x2c   : > { %1133 = shalt.err (!%p1130_p5)
}
  0x2d   : > { %924 = dma.hbm_to_vmem [thread:$0]  (!%p1368_p7), %s244_s24, 128, %s246_s23, %s234_s28  }
  0x2e   : > { %254 = sbr.rel (%p1296_p3) target bundleno = 1134 (0x46e), region = 40  ;;  %s1385_s10 = sand.u32 (!%p1296_p3), 1, %s1215_s19  }
  0x2f   : > { %s826_s17 = sshll.u32 (!%p1296_p3), %s1385_s10, 3  ;;  %s257_s22 = scalar_lea.sflag (!%p1296_p3), [#allocation4], %s1385_s10 }
  0x30   : > { %s260_s30 = scalar_lea.vmem (!%p1296_p3), [#allocation3], %s826_s17 }
  0x33   : > { %1194 = dma.done.wait (%p1347_p12), %s257_s22, 128  }
  0x34   : > { %1196 = vsyncadd (%p1347_p12), %s257_s22, 4294967168 }
  0x35   : > { %1198 = dma.done.wait (%p44_p1), [#allocation7], 512  }
  0x36   : > { %1200 = vsyncadd (%p44_p1), [#allocation7], 4294966784 }
  0x37   : > { %1202 = dma.done.wait (%p44_p1), [#allocation10], 512  }
  0x38   : > { %1204 = vsyncadd (%p44_p1), [#allocation10], 4294966784  ;;  %v881_v0 = vld [vmem:[#allocation6 + $0x8] sm:$0xff]  ;;  %v883_v1 = vld [vmem:[#allocation8 + $0x8] sm:$0xff]  ;;  %vm327_vm0 = vcmask 261120   ;;  %vm405_vm1 = vcmask 64512  }
  0x39   : > { %337 = vmatpush.bf16.msra.mxu0 %v881_v0  ;;  %367 = vmatpush.bf16.msra.mxu1 %v883_v1  ;;  %v880_v2 = vld [vmem:[#allocation6] sm:$0xff]  ;;  %v882_v3 = vld [vmem:[#allocation8] sm:$0xff]  ;;  %s1231_s26 = smov 112   ;;  %s1232_s7 = smov 120   ;;  %v885_v17 = vld [vmem:[#allocation9 + $0x8] sm:$0xff]  ;;  %vm440_vm2 = vcmask 1043456  }
  0x3a   : > { %v309_v4 = vld [vmem:[%s260_s30] sm:$0xff]  ;;  %s1233_s23 = smov 104   ;;  %397 = vmatpush.bf16.msra.mxu2 %v885_v17  ;;  %v884_v30 = vld [vmem:[#allocation9] sm:$0xff]  ;;  %vm458_vm3 = vcmask 60416   ;;  %s1234_s24 = smov 8   ;;  %vm530_vm4 = vcmask 126016  }
  0x3b   : > { %v310_v5 = vpack.c.bf16 %v309_v4, %v309_v4  ;;  %s1235_s27 = smov 24   ;;  %s1236_s28 = smov 16   ;;  %vm593_vm5 = vcmask 191616   ;;  %vm656_vm6 = vcmask 257216  }
  0x3c   : > { %s877_s6 = sshll.u32 %s1291_s25, 3  ;;  %s307_s16 = scalar_lea.vmem [#allocation12], %s826_s17 }
  0x3d   : > { %338 = vmatpush.bf16.msra.mxu0 %v880_v2  ;;  %368 = vmatpush.bf16.msra.mxu1 %v882_v3  ;;  %s703_s15 = scalar_lea.hbm %s1481_s5, %s877_s6  ;;  %s705_s9 = sshll.u32 %s307_s16, 4  ;;  %s706_s9 = int_to_ptr.vmem [resolvable:$true] %s705_s9 }
  0x3e   : > { %398 = vmatpush.bf16.msra.mxu2 %v884_v30  ;;  %s707_s22 = sshll.u32 %s703_s15, 4  ;;  %s693_s30 = scalar_lea.sflag [#allocation5], %s1385_s10  ;;  %s708_s22 = int_to_ptr.hbm [resolvable:$true] %s707_s22 }
  0x40   : > { %840 = vmatmul.msk.bf16.vlgmr.msra.gmra.mxu0 %vm327_vm0, %v310_v5  ;;  %849 = vmatmul.msk.bf16.vlgmr.msra.gmra.mxu1 %vm327_vm0, %v310_v5 }
  0x41   : > { %858 = vmatmul.msk.bf16.vlgmr.msra.gmra.mxu2 %vm327_vm0, %v310_v5 }
  0xbd   : > { %v340_v6 = vpop.f32.mrf.mxu0  ;;  %v370_v7 = vpop.f32.mrf.mxu1 }
  0xbe   : > { %v344_v8 = vpack.c.bf16 %v340_v6, %v340_v6  ;;  %v374_v9 = vpack.c.bf16 %v370_v7, %v370_v7 }
  0xc0   : > { %v461_v10 = vunpack.c.l.b16 %v344_v8  ;;  %v466_v11 = vunpack.c.l.b16 %v374_v9  ;;  %v410_v12 = vsel %vm405_vm1, %v374_v9, 0 }
  0xc1   : > { %419 = vmatpush.bf16.xpose.msra.mxu3 %v410_v12 }
  0xc2   : > { %v462_v13 = vpack.c.b16 %v461_v10, %v461_v10  ;;  %v467_v14 = vpack.c.b16 %v466_v11, %v466_v11 }
  0xc4   : > { %534 = vrot.lane.b32.xlu1 %v467_v14, %s1231_s26  ;;  %468 = vrot.lane.b32.xlu0 %v467_v14, %s1232_s7  ;;  %v400_v45 = vpop.f32.mrf.mxu2 }
  0xc5   : > { %532 = vrot.lane.b32.xlu2 %v462_v13, %s1231_s26  ;;  %v342_v15 = vpop.f32.mrf.mxu0  ;;  %v372_v16 = vpop.f32.mrf.mxu1  ;;  %v404_v46 = vpack.c.bf16 %v400_v45, %v400_v45 }
  0xc7   : > { %v502_v47 = vunpack.c.l.b16 %v404_v46  ;;  %v442_v48 = vsel %vm440_vm2, %v404_v46, 0 }
  0xc8   : > { %859 = vmatmul.msk.bf16.vlgmr.msra.gmra.mxu3 %vm405_vm1, %v344_v8  ;;  %451 = vmatpush.bf16.msrb.mxu0 %v442_v48 }
  0xc9   : > { %v503_v49 = vpack.c.b16 %v502_v47, %v502_v47 }
  0xcc   : > { %597 = vrot.lane.b32.xlu1 %v467_v14, %s1233_s23  ;;  %463 = vrot.lane.b32.xlu0 %v462_v13, %s1232_s7  ;;  %v402_v50 = vpop.f32.mrf.mxu2 }
  0xcd   : > { %595 = vrot.lane.b32.xlu2 %v462_v13, %s1233_s23 }
 0x11f   : > { %v533_v22 = vpop.permute.xlu2 %532 }
 0x127   : > { %v596_v28 = vpop.permute.xlu2 %595 }
 0x136   : > { %v535_v18 = vpop.permute.xlu1 %534  ;;  %v469_v19 = vpop.permute.xlu0 %468 }
 0x137   : > { %v474_v20 = vsel %vm405_vm1, %v469_v19, 0  ;;  %v540_v21 = vsel %vm405_vm1, %v535_v18, 0 }
 0x138   : > { %483 = vmatpush.bf16.xpose.msrb.mxu1 %v474_v20  ;;  %549 = vmatpush.bf16.xpose.msrb.mxu3 %v540_v21 }
 0x13e   : > { %v598_v23 = vpop.permute.xlu1 %597  ;;  %v464_v24 = vpop.permute.xlu0 %463 }
 0x13f   : > { %v603_v25 = vsel %vm405_vm1, %v598_v23, 0  ;;  %861 = vmatmul.msk.bf16.vlgmr.msrb.gmra.mxu1 %vm405_vm1, %v464_v24  ;;  %863 = vmatmul.msk.bf16.vlgmr.msrb.gmra.mxu3 %vm405_vm1, %v533_v22 }
 0x140   : > { %612 = vmatpush.bf16.xpose.msra.mxu1 %v603_v25 }
 0x14b   : > { %v421_v26 = vpop.f32.mrf.mxu3 }
 0x14c   : > { %v425_v27 = vsel %vm405_vm1, %v421_v26, -inf }
 0x14d   : > { %426 = vmax.xlane.f32.xlu1 %v425_v27 }
 0x14f   : > { %865 = vmatmul.msk.bf16.vlgmr.msra.gmra.mxu1 %vm405_vm1, %v596_v28 }
 0x153   : > { %v423_v29 = vpop.f32.mrf.mxu3 }
 0x1bc   : > { %v485_v31 = vpop.f32.mrf.mxu1 }
 0x1bd   : > { %v489_v32 = vsel %vm405_vm1, %v485_v31, -inf }
 0x1be   : > { %490 = vmax.xlane.f32.xlu0 %v489_v32 }
 0x1c0   : > { %v427_v33 = vpop.xlane.xlu1 %426 }
 0x1c1   : > { %v428_v34 = vsub.f32 %v421_v26, %v427_v33 }
 0x1c2   : > { %v551_v35 = vpop.f32.mrf.mxu3 }
 0x1c3   : > { %v429_v36 = vmul.f32 1.442695, %v428_v34  ;;  %v555_v44 = vsel %vm405_vm1, %v551_v35, -inf }
 0x1c4   : > { %v487_v37 = vpop.f32.mrf.mxu1 }
 0x1c5   : > { %983 = vpow2.f32 %v429_v36  ;;  %v887_v37 = vld [vmem:[#allocation11 + $0x8] sm:$0xff] }
 0x1c6   : > { %684 = vmatpush.bf16.msra.mxu3 %v887_v37 }
 0x1ca   : > { %v553_v38 = vpop.f32.mrf.mxu3 }
 0x1cb   : > { %v984_v39 = vpop.eup %983  ;;  %v886_v38 = vld [vmem:[#allocation11] sm:$0xff] }
 0x1cc   : > { %v614_v40 = vpop.f32.mrf.mxu1  ;;  %v431_v41 = vsel %vm405_vm1, %v984_v39, 0.0  ;;  %685 = vmatpush.bf16.msra.mxu3 %v886_v38 }
 0x1cd   : > { %432 = vadd.xlane.f32.xlu1 %v431_v41  ;;  %v618_v42 = vsel %vm405_vm1, %v614_v40, -inf }
 0x1ce   : > { %619 = vmax.xlane.f32.xlu2 %v618_v42 }
 0x1d4   : > { %v616_v43 = vpop.f32.mrf.mxu1 }
 0x1d6   : > { %556 = vmax.xlane.f32.xlu2 %v555_v44 }
 0x1ee   : > { %504 = vrot.lane.b32.xlu2 %v503_v49, %s1232_s7 }
 0x231   : > { %v491_v51 = vpop.xlane.xlu0 %490 }
 0x232   : > { %v492_v52 = vsub.f32 %v485_v31, %v491_v51 }
 0x234   : > { %v493_v53 = vmul.f32 1.442695, %v492_v52 }
 0x236   : > { %985 = vpow2.f32 %v493_v53 }
 0x23c   : > { %v986_v54 = vpop.eup %985 }
 0x23d   : > { %v495_v55 = vsel %vm405_vm1, %v986_v54, 0.0 }
 0x23e   : > { %496 = vadd.xlane.f32.xlu0 %v495_v55 }
 0x240   : > { %v433_v56 = vpop.xlane.xlu1 %432 }
 0x241   : > { %987 = vrcp.f32 %v433_v56  ;;  %v620_v57 = vpop.xlane.xlu2 %619 }
 0x242   : > { %v621_v58 = vsub.f32 %v614_v40, %v620_v57 }
 0x244   : > { %v622_v59 = vmul.f32 1.442695, %v621_v58 }
 0x246   : > { %989 = vpow2.f32 %v622_v59 }
 0x247   : > { %v988_v60 = vpop.eup %987 }
 0x248   : > { %v435_v61 = vmul.f32 %v988_v60, %v984_v39 }
 0x249   : > { %v557_v62 = vpop.xlane.xlu2 %556 }
 0x24a   : > { %v558_v63 = vsub.f32 %v551_v35, %v557_v62  ;;  %v436_v0 = vpack.c.bf16 %v435_v61, %v435_v61 }
 0x24c   : > { %v990_v1 = vpop.eup %989  ;;  %v559_v2 = vmul.f32 1.442695, %v558_v63  ;;  %860 = vmatmul.msk.bf16.vlgmr.msrb.gmra.mxu0 %vm405_vm1, %v436_v0 }
 0x24d   : > { %v624_v3 = vsel %vm405_vm1, %v990_v1, 0.0 }
 0x24e   : > { %991 = vpow2.f32 %v559_v2  ;;  %625 = vadd.xlane.f32.xlu0 %v624_v3 }
 0x251   : > { %v505_v6 = vpop.permute.xlu2 %504 }
 0x252   : > { %v510_v7 = vsel %vm440_vm2, %v505_v6, 0 }
 0x253   : > { %519 = vmatpush.bf16.msrb.mxu2 %v510_v7 }
 0x254   : > { %v992_v4 = vpop.eup %991 }
 0x255   : > { %v561_v5 = vsel %vm405_vm1, %v992_v4, 0.0 }
 0x256   : > { %562 = vadd.xlane.f32.xlu1 %v561_v5 }
 0x262   : > { %630 = vrot.lane.b32.xlu0 %v503_v49, %s1233_s23 }
 0x26f   : > { %567 = vrot.lane.b32.xlu1 %v503_v49, %s1231_s26  ;;  %s1163_s26 = sshra.s32 %s708_s22, 4  ;;  %s1164_s26 = int_to_ptr.hbm [resolvable:$true] %s1163_s26 }
 0x270   : > { %s1165_s7 = scalar_lea.hbm %s1164_s26, 8  ;;  %p1170_p12 = scmp.lt.s32.totalorder %s1164_s26, %s1481_s5 }
 0x271   : > { %p1166_p1 = scmp.ne.s32.totalorder %s1164_s26, %s1165_s7 }
 0x273   : > { %p1167_p3 = pnand %p1166_p1, %p1354_p4 }
 0x275   : > { %p1168_p5 = pneg %p1167_p3 }
 0x2b1   : > { %v497_v8 = vpop.xlane.xlu0 %496 }
 0x2b2   : > { %993 = vrcp.f32 %v497_v8 }
 0x2b8   : > { %v994_v9 = vpop.eup %993 }
 0x2b9   : > { %v499_v10 = vmul.f32 %v994_v9, %v986_v54 }
 0x2bb   : > { %v500_v11 = vpack.c.bf16 %v499_v10, %v499_v10 }
 0x2bd   : > { %862 = vmatmul.msk.bf16.vlgmr.msrb.gmra.mxu2 %vm405_vm1, %v500_v11 }
 0x2c1   : > { %v626_v12 = vpop.xlane.xlu0 %625 }
 0x2c2   : > { %995 = vrcp.f32 %v626_v12 }
 0x2c8   : > { %v996_v15 = vpop.eup %995 }
 0x2c9   : > { %v453_v13 = vpop.f32.mrf.mxu0  ;;  %v628_v17 = vmul.f32 %v996_v15, %v990_v1  ;;  %v563_v18 = vpop.xlane.xlu1 %562 }
 0x2ca   : > { %v457_v14 = vpack.c.bf16 %v453_v13, %v453_v13  ;;  %997 = vrcp.f32 %v563_v18 }
 0x2cb   : > { %v629_v21 = vpack.c.bf16 %v628_v17, %v628_v17 }
 0x2cc   : > { %459 = vst.msk [vmem:[#allocation2] sm:$0xf] %vm458_vm3, %v457_v14 }
 0x2d0   : > { %v998_v22 = vpop.eup %997 }
 0x2d1   : > { %v455_v16 = vpop.f32.mrf.mxu0  ;;  %v565_v23 = vmul.f32 %v998_v22, %v992_v4 }
 0x2d3   : > { %v566_v26 = vpack.c.bf16 %v565_v23, %v565_v23 }
 0x2d4   : > { %v631_v19 = vpop.permute.xlu0 %630 }
 0x2d5   : > { %v636_v20 = vsel %vm440_vm2, %v631_v19, 0 }
 0x2d6   : > { %645 = vmatpush.bf16.msra.mxu2 %v636_v20 }
 0x2d9   : > { %866 = vmatmul.msk.bf16.vlgmr.msra.gmra.mxu2 %vm405_vm1, %v629_v21 }
 0x2e1   : > { %v568_v24 = vpop.permute.xlu1 %567 }
 0x2e2   : > { %v573_v25 = vsel %vm440_vm2, %v568_v24, 0 }
 0x2e3   : > { %582 = vmatpush.bf16.msra.mxu0 %v573_v25 }
 0x2e6   : > { %864 = vmatmul.msk.bf16.vlgmr.msra.gmra.mxu0 %vm405_vm1, %v566_v26 }
 0x340   : > { %v521_v27 = vpop.f32.mrf.mxu2 }
 0x341   : > { %v525_v28 = vpack.c.bf16 %v521_v27, %v521_v27 }
 0x343   : > { %527 = vrot.lane.b32.xlu2 %v525_v28, %s1234_s24  ;;  %s1169_s24 = scalar_lea.hbm %s1481_s5, 16 }
 0x344   : > { %p1171_p7 = scmp.lt.s32.totalorder %s1169_s24, %s1165_s7 }
 0x346   : > { %p1172_p8 = por %p1171_p7, %p1170_p12 }
 0x348   : > { %v523_v29 = vpop.f32.mrf.mxu2  ;;  %p1173_p9 = pnand %p1172_p8, %p1168_p5 }
 0x35c   : > { %v647_v30 = vpop.f32.mrf.mxu2 }
 0x35d   : > { %v651_v31 = vpack.c.bf16 %v647_v30, %v647_v30 }
 0x35f   : > { %653 = vrot.lane.b32.xlu2 %v651_v31, %s1235_s27 }
 0x363   : > { %v584_v32 = vpop.f32.mrf.mxu0 }
 0x364   : > { %v588_v33 = vpack.c.bf16 %v584_v32, %v584_v32  ;;  %v649_v34 = vpop.f32.mrf.mxu2 }
 0x366   : > { %590 = vrot.lane.b32.xlu0 %v588_v33, %s1236_s28 }
 0x36b   : > { %v586_v35 = vpop.f32.mrf.mxu0 }
 0x39d   : > { %v528_v36 = vpop.permute.xlu2 %527 }
 0x39e   : > { %531 = vst.msk [vmem:[#allocation2] sm:$0xf] %vm530_vm4, %v528_v36 }
 0x3b9   : > { %v654_v40 = vpop.permute.xlu2 %653 }
 0x3d8   : > { %v591_v39 = vpop.permute.xlu0 %590 }
 0x3d9   : > { %594 = vst.msk [vmem:[#allocation2] sm:$0xf] %vm593_vm5, %v591_v39 }
 0x3da   : > { %657 = vst.msk [vmem:[#allocation2] sm:$0xf] %vm656_vm6, %v654_v40 }
 0x3e1   : > { %v658_v41 = vld [vmem:[#allocation2] sm:$0xf] }
 0x3e2   : > { %875 = vmatmul.msk.bf16.vlgmr.msra.gmra.mxu3 %vm327_vm0, %v658_v41 }
 0x465   : > { %v687_v42 = vpop.f32.mrf.mxu3 }
 0x466   : > { %691 = vst.msk [vmem:[%s307_s16] sm:$0xff] %vm327_vm0, %v687_v42 }
 0x467   : > { %1176 = shalt.err (!%p1173_p9)
}
 0x468   : > { %906 = dma.vmem_to_hbm [thread:$0]  (%p1354_p4), %s706_s9, 128, %s708_s22, %s693_s30  }
 0x46d   : > { %v689_v43 = vpop.f32.mrf.mxu3 }
 0x46e PF: > { %s719_s10 = sand.u32 1, %s1211_s18   ;;  %p1489_p10 = scmp.ge.s32.totalorder %s1223_s21, 2 }
 0x46f   : > { %s720_s28 = scalar_lea.sflag [#allocation5], %s719_s10 }
 0x470   : > { %p926_p13 = pnand %p1489_p10, %p1358_p6 }
 0x472   : > { %p927_p11 = pneg %p926_p13 }
 0x474   : > { %1206 = dma.done.wait (%p927_p11), %s720_s28, 128  }
 0x475   : > { %1208 = vsyncadd (%p927_p11), %s720_s28, 4294967168  ;;  %p20_p0 = scmp.ge.s32.totalorder %s1328_s29, 4   ;;  %s1490_s18 = smov %s1215_s19 }
 0x476   : > { %s1491_s19 = smov %s1219_s20  ;;  %s1492_s20 = smov %s1339_s8 }
 0x477   : > { %s1493_s21 = smov %s1328_s29  ;;  %22 = sbr.rel (!%p20_p0) target bundleno = 7 (0x7), region = 101 }
 0x47c   :  { %726 = vsyncpa [#allocation4], 1 }
 0x47d   :  { %728 = vsyncpa [#allocation4 + $0x1], 1 }
 0x47e   :  { %729 = vsyncpa [#allocation7], 1 }
 0x47f   :  { %730 = vsyncpa [#allocation10], 1 }
 0x480   :  { %731 = vsyncpa [#allocation5], 1 }
 0x481   :  { %733 = vsyncpa [#allocation5 + $0x1], 1 }

// kernel: tpu_custom_call.1
= control target key start
LH: loop header
LB: loop body
LE: loop exit
PB: predicated region body
PF: predicated region fallthrough
CT: control target
= control target key end

     0   :  { %10 = vsyncpa [#allocation4], 0  ;;  %s1476_s0 = inlined_call_operand.hbm [shape: f32[2,8,32], index: 0, kind: input, shape index: {}]   ;;  %s1477_s1 = inlined_call_operand.hbm [shape: bf16[32,32], index: 1, kind: input, shape index: {}]   ;;  %s1478_s2 = inlined_call_operand.hbm [shape: bf16[32,32], index: 2, kind: input, shape index: {}]   ;;  %s1479_s3 = inlined_call_operand.hbm [shape: bf16[32,32], index: 3, kind: input, shape index: {}]   ;;  %s1480_s4 = inlined_call_operand.hbm [shape: bf16[32,32], index: 4, kind: input, shape index: {}]   ;;  %s1481_s5 = inlined_call_operand.hbm [shape: f32[2,8,32], index: 5, kind: output, shape index: {}]  }
   0x1   :  { %12 = vsyncpa [#allocation4 + $0x1], 0 }
   0x2   :  { %13 = vsyncpa [#allocation7], 0 }
   0x3   :  { %14 = vsyncpa [#allocation10], 0 }
   0x4   :  { %15 = vsyncpa [#allocation5], 0 }
   0x5   :  { %17 = vsyncpa [#allocation5 + $0x1], 0  ;;  %s1267_s18 = smov 0   ;;  %s1269_s19 = smov 0  }
   0x6   :  { %s1271_s20 = smov 0   ;;  %s1273_s21 = smov 0  }
   0x7 LB: > { %s175_s24 = sshll.u32 %s1477_s1, 4  ;;  %s1291_s25 = sadd.s32 4294967295, %s1223_s21   ;;  %s1223_s21 = sphi %s1273_s21, %s1493_s21   ;;  %s1219_s20 = sphi %s1271_s20, %s1492_s20   ;;  %s1215_s19 = sphi %s1269_s19, %s1491_s19   ;;  %s1211_s18 = sphi %s1267_s18, %s1490_s18   ;;  %s176_s24 = int_to_ptr.hbm [resolvable:$true] %s175_s24 }
   0x8   : > { %p817_p0 = scmp.ge.s32.totalorder %s1223_s21, 1  ;;  %p44_p1 = scmp.eq.s32.totalorder %s1291_s25, 0 }
   0x9   : > { %p164_p2 = scmp.lt.s32.totalorder %s1223_s21, 3  ;;  %s1225_s27 = smov [#allocation6]  }
   0xa   : > { %s177_s28 = sshll.u32 %s1225_s27, 4  ;;  %s203_s6 = sshll.u32 %s1479_s3, 4  ;;  %s178_s28 = int_to_ptr.vmem [resolvable:$true] %s177_s28  ;;  %s204_s6 = int_to_ptr.hbm [resolvable:$true] %s203_s6 }
   0xb   : > { %p1296_p3 = pnand %p817_p0, %p164_p2  ;;  %s189_s10 = sshll.u32 %s1478_s2, 4  ;;  %s190_s10 = int_to_ptr.hbm [resolvable:$true] %s189_s10 }
   0xc   : > { %s1226_s11 = smov [#allocation9]   ;;  %s1227_s13 = smov 64  }
   0xd   : > { %p908_p4 = pneg %p1296_p3  ;;  %s205_s12 = sshll.u32 %s1226_s11, 4  ;;  %s206_s12 = int_to_ptr.vmem [resolvable:$true] %s205_s12 }
   0xe   : > { %s1228_s14 = smov 4   ;;  %s217_s17 = sshll.u32 %s1480_s4, 4  ;;  %s218_s17 = int_to_ptr.hbm [resolvable:$true] %s217_s17 }
   0xf   : > { %p1308_p6 = pnand %p908_p4, %p44_p1  ;;  %s1229_s22 = smov [#allocation8]  }
  0x10   : > { %s191_s23 = sshll.u32 %s1229_s22, 4  ;;  %s1328_s29 = sadd.s32 1, %s1223_s21   ;;  %s192_s23 = int_to_ptr.vmem [resolvable:$true] %s191_s23 }
  0x11   : > { %911 = dma.hbm_to_vmem [thread:$0]  (!%p1308_p6), %s176_s24, 256, %s178_s28, [#allocation7], %s1227_s13, %s1227_s13, %s1228_s14  }
  0x12   : > { %917 = dma.hbm_to_vmem [thread:$0]  (!%p1308_p6), %s204_s6, 256, %s206_s12, [#allocation10], %s1227_s13, %s1227_s13, %s1228_s14  }
  0x13   : > { %914 = dma.hbm_to_vmem [thread:$0]  (!%p1308_p6), %s190_s10, 256, %s192_s23, [#allocation7], %s1227_s13, %s1227_s13, %s1228_s14  }
  0x14   : > { %s1230_s24 = smov [#allocation11]   ;;  %s816_s28 = sadd.s32 4294967294, %s1223_s21  }
  0x15   : > { %s219_s27 = sshll.u32 %s1230_s24, 4  ;;  %s27_s30 = ssub.s32 %s1223_s21, %s1328_s29  ;;  %s220_s27 = int_to_ptr.vmem [resolvable:$true] %s219_s27 }
  0x16   : > { %920 = dma.hbm_to_vmem [thread:$0]  (!%p1308_p6), %s218_s17, 256, %s220_s27, [#allocation10], %s1227_s13, %s1227_s13, %s1228_s14  }
  0x17   : > { %s30_s6 = sadd.s32 1, %s1219_s20  ;;  %p28_p7 = scmp.eq.s32.totalorder %s27_s30, 0 }
  0x18   : > { %p37_p8 = scmp.ne.s32.totalorder %s1219_s20, %s1215_s19  ;;  %p38_p9 = scmp.eq.s32.totalorder %s1223_s21, 0 }
  0x19   : > { %p43_p10 = scmp.ne.s32.totalorder %s1215_s19, %s1211_s18  ;;  %p151_p13 = scmp.eq.s32.totalorder %s1291_s25, 1 }
  0x1a   : > { %s1339_s8 = scalar_select %p28_p7, %s1219_s20, %s30_s6  }
  0x1b   : > { %p1341_p11 = por %p38_p9, %p37_p8  ;;  %p1347_p12 = por %p44_p1, %p43_p10 }
  0x1c   : > { %p157_p0 = scmp.eq.s32.totalorder %s816_s28, 1  ;;  %p933_p2 = scmp.lt.s32.totalorder %s1223_s21, 2 }
  0x1d   : > { %s233_s10 = sand.u32 1, %s1219_s20   ;;  %p1354_p4 = por %p151_p13, %p37_p8 }
  0x1e   : > { %p1358_p6 = por %p157_p0, %p43_p10  ;;  %s823_s13 = sshll.u32 %s233_s10, 3 }
  0x1f   : > { %s824_s14 = sshll.u32 %s1223_s21, 3  ;;  %s237_s22 = scalar_lea.vmem [#allocation3], %s823_s13 }
  0x20   : > { %s241_s17 = scalar_lea.hbm %s1476_s0, %s824_s14  ;;  %s245_s23 = sshll.u32 %s237_s22, 4  ;;  %s246_s23 = int_to_ptr.vmem [resolvable:$true] %s245_s23 }
  0x21   : > { %s243_s24 = sshll.u32 %s241_s17, 4  ;;  %p1368_p7 = pnand %p933_p2, %p1341_p11  ;;  %s244_s24 = int_to_ptr.hbm [resolvable:$true] %s243_s24 }
  0x22   : > { %s234_s28 = scalar_lea.sflag [#allocation4], %s233_s10  ;;  %s1119_s30 = sshra.s32 %s244_s24, 4  ;;  %s1120_s30 = int_to_ptr.hbm [resolvable:$true] %s1119_s30 }
  0x23   : > { %s1121_s6 = scalar_lea.hbm %s1120_s30, 8  ;;  %p1123_p9 = pneg %p1368_p7 }
  0x24   : > { %p1122_p8 = scmp.ne.s32.totalorder %s1120_s30, %s1121_s6  ;;  %s1126_s15 = scalar_lea.hbm %s1476_s0, 16 }
  0x25   : > { %p1127_p11 = scmp.lt.s32.totalorder %s1120_s30, %s1476_s0  ;;  %p1128_p0 = scmp.lt.s32.totalorder %s1126_s15, %s1121_s6 }
  0x26   : > { %p1124_p10 = pnand %p1123_p9, %p1122_p8 }
  0x27   : > { %p1129_p2 = por %p1128_p0, %p1127_p11 }
  0x28   : > { %p1125_p13 = pneg %p1124_p10 }
  0x2a   : > { %p1130_p5 = pnand %p1129_p2, %p1125_p13 }
  0x2c   : > { %1133 = shalt.err (!%p1130_p5)
}
  0x2d   : > { %924 = dma.hbm_to_vmem [thread:$0]  (!%p1368_p7), %s244_s24, 128, %s246_s23, %s234_s28  }
  0x2e   : > { %254 = sbr.rel (%p1296_p3) target bundleno = 1134 (0x46e), region = 40  ;;  %s1385_s10 = sand.u32 (!%p1296_p3), 1, %s1215_s19  }
  0x2f   : > { %s826_s17 = sshll.u32 (!%p1296_p3), %s1385_s10, 3  ;;  %s257_s22 = scalar_lea.sflag (!%p1296_p3), [#allocation4], %s1385_s10 }
  0x30   : > { %s260_s30 = scalar_lea.vmem (!%p1296_p3), [#allocation3], %s826_s17 }
  0x33   : > { %1194 = dma.done.wait (%p1347_p12), %s257_s22, 128  }
  0x34   : > { %1196 = vsyncadd (%p1347_p12), %s257_s22, 4294967168 }
  0x35   : > { %1198 = dma.done.wait (%p44_p1), [#allocation7], 512  }
  0x36   : > { %1200 = vsyncadd (%p44_p1), [#allocation7], 4294966784 }
  0x37   : > { %1202 = dma.done.wait (%p44_p1), [#allocation10], 512  }
  0x38   : > { %1204 = vsyncadd (%p44_p1), [#allocation10], 4294966784  ;;  %v881_v0 = vld [vmem:[#allocation6 + $0x8] sm:$0xff]  ;;  %v883_v1 = vld [vmem:[#allocation8 + $0x8] sm:$0xff]  ;;  %vm327_vm0 = vcmask 261120   ;;  %vm405_vm1 = vcmask 64512  }
  0x39   : > { %337 = vmatpush.bf16.msra.mxu0 %v881_v0  ;;  %367 = vmatpush.bf16.msra.mxu1 %v883_v1  ;;  %v880_v2 = vld [vmem:[#allocation6] sm:$0xff]  ;;  %v882_v3 = vld [vmem:[#allocation8] sm:$0xff]  ;;  %s1231_s26 = smov 112   ;;  %s1232_s7 = smov 120   ;;  %v885_v17 = vld [vmem:[#allocation9 + $0x8] sm:$0xff]  ;;  %vm440_vm2 = vcmask 1043456  }
  0x3a   : > { %v309_v4 = vld [vmem:[%s260_s30] sm:$0xff]  ;;  %s1233_s23 = smov 104   ;;  %397 = vmatpush.bf16.msra.mxu2 %v885_v17  ;;  %v884_v30 = vld [vmem:[#allocation9] sm:$0xff]  ;;  %vm458_vm3 = vcmask 60416   ;;  %s1234_s24 = smov 8   ;;  %vm530_vm4 = vcmask 126016  }
  0x3b   : > { %v310_v5 = vpack.c.bf16 %v309_v4, %v309_v4  ;;  %s1235_s27 = smov 24   ;;  %s1236_s28 = smov 16   ;;  %vm593_vm5 = vcmask 191616   ;;  %vm656_vm6 = vcmask 257216  }
  0x3c   : > { %s877_s6 = sshll.u32 %s1291_s25, 3  ;;  %s307_s16 = scalar_lea.vmem [#allocation12], %s826_s17 }
  0x3d   : > { %338 = vmatpush.bf16.msra.mxu0 %v880_v2  ;;  %368 = vmatpush.bf16.msra.mxu1 %v882_v3  ;;  %s703_s15 = scalar_lea.hbm %s1481_s5, %s877_s6  ;;  %s705_s9 = sshll.u32 %s307_s16, 4  ;;  %s706_s9 = int_to_ptr.vmem [resolvable:$true] %s705_s9 }
  0x3e   : > { %398 = vmatpush.bf16.msra.mxu2 %v884_v30  ;;  %s707_s22 = sshll.u32 %s703_s15, 4  ;;  %s693_s30 = scalar_lea.sflag [#allocation5], %s1385_s10  ;;  %s708_s22 = int_to_ptr.hbm [resolvable:$true] %s707_s22 }
  0x40   : > { %840 = vmatmul.msk.bf16.vlgmr.msra.gmra.mxu0 %vm327_vm0, %v310_v5  ;;  %849 = vmatmul.msk.bf16.vlgmr.msra.gmra.mxu1 %vm327_vm0, %v310_v5 }
  0x41   : > { %858 = vmatmul.msk.bf16.vlgmr.msra.gmra.mxu2 %vm327_vm0, %v310_v5 }
  0xbd   : > { %v340_v6 = vpop.f32.mrf.mxu0  ;;  %v370_v7 = vpop.f32.mrf.mxu1 }
  0xbe   : > { %v344_v8 = vpack.c.bf16 %v340_v6, %v340_v6  ;;  %v374_v9 = vpack.c.bf16 %v370_v7, %v370_v7 }
  0xc0   : > { %v461_v10 = vunpack.c.l.b16 %v344_v8  ;;  %v466_v11 = vunpack.c.l.b16 %v374_v9  ;;  %v410_v12 = vsel %vm405_vm1, %v374_v9, 0 }
  0xc1   : > { %419 = vmatpush.bf16.xpose.msra.mxu3 %v410_v12 }
  0xc2   : > { %v462_v13 = vpack.c.b16 %v461_v10, %v461_v10  ;;  %v467_v14 = vpack.c.b16 %v466_v11, %v466_v11 }
  0xc4   : > { %534 = vrot.lane.b32.xlu1 %v467_v14, %s1231_s26  ;;  %468 = vrot.lane.b32.xlu0 %v467_v14, %s1232_s7  ;;  %v400_v45 = vpop.f32.mrf.mxu2 }
  0xc5   : > { %532 = vrot.lane.b32.xlu2 %v462_v13, %s1231_s26  ;;  %v342_v15 = vpop.f32.mrf.mxu0  ;;  %v372_v16 = vpop.f32.mrf.mxu1  ;;  %v404_v46 = vpack.c.bf16 %v400_v45, %v400_v45 }
  0xc7   : > { %v502_v47 = vunpack.c.l.b16 %v404_v46  ;;  %v442_v48 = vsel %vm440_vm2, %v404_v46, 0 }
  0xc8   : > { %859 = vmatmul.msk.bf16.vlgmr.msra.gmra.mxu3 %vm405_vm1, %v344_v8  ;;  %451 = vmatpush.bf16.msrb.mxu0 %v442_v48 }
  0xc9   : > { %v503_v49 = vpack.c.b16 %v502_v47, %v502_v47 }
  0xcc   : > { %597 = vrot.lane.b32.xlu1 %v467_v14, %s1233_s23  ;;  %463 = vrot.lane.b32.xlu0 %v462_v13, %s1232_s7  ;;  %v402_v50 = vpop.f32.mrf.mxu2 }
  0xcd   : > { %595 = vrot.lane.b32.xlu2 %v462_v13, %s1233_s23 }
 0x11f   : > { %v533_v22 = vpop.permute.xlu2 %532 }
 0x127   : > { %v596_v28 = vpop.permute.xlu2 %595 }
 0x136   : > { %v535_v18 = vpop.permute.xlu1 %534  ;;  %v469_v19 = vpop.permute.xlu0 %468 }
 0x137   : > { %v474_v20 = vsel %vm405_vm1, %v469_v19, 0  ;;  %v540_v21 = vsel %vm405_vm1, %v535_v18, 0 }
 0x138   : > { %483 = vmatpush.bf16.xpose.msrb.mxu1 %v474_v20  ;;  %549 = vmatpush.bf16.xpose.msrb.mxu3 %v540_v21 }
 0x13e   : > { %v598_v23 = vpop.permute.xlu1 %597  ;;  %v464_v24 = vpop.permute.xlu0 %463 }
 0x13f   : > { %v603_v25 = vsel %vm405_vm1, %v598_v23, 0  ;;  %861 = vmatmul.msk.bf16.vlgmr.msrb.gmra.mxu1 %vm405_vm1, %v464_v24  ;;  %863 = vmatmul.msk.bf16.vlgmr.msrb.gmra.mxu3 %vm405_vm1, %v533_v22 }
 0x140   : > { %612 = vmatpush.bf16.xpose.msra.mxu1 %v603_v25 }
 0x14b   : > { %v421_v26 = vpop.f32.mrf.mxu3 }
 0x14c   : > { %v425_v27 = vsel %vm405_vm1, %v421_v26, -inf }
 0x14d   : > { %426 = vmax.xlane.f32.xlu1 %v425_v27 }
 0x14f   : > { %865 = vmatmul.msk.bf16.vlgmr.msra.gmra.mxu1 %vm405_vm1, %v596_v28 }
 0x153   : > { %v423_v29 = vpop.f32.mrf.mxu3 }
 0x1bc   : > { %v485_v31 = vpop.f32.mrf.mxu1 }
 0x1bd   : > { %v489_v32 = vsel %vm405_vm1, %v485_v31, -inf }
 0x1be   : > { %490 = vmax.xlane.f32.xlu0 %v489_v32 }
 0x1c0   : > { %v427_v33 = vpop.xlane.xlu1 %426 }
 0x1c1   : > { %v428_v34 = vsub.f32 %v421_v26, %v427_v33 }
 0x1c2   : > { %v551_v35 = vpop.f32.mrf.mxu3 }
 0x1c3   : > { %v429_v36 = vmul.f32 1.442695, %v428_v34  ;;  %v555_v44 = vsel %vm405_vm1, %v551_v35, -inf }
 0x1c4   : > { %v487_v37 = vpop.f32.mrf.mxu1 }
 0x1c5   : > { %983 = vpow2.f32 %v429_v36  ;;  %v887_v37 = vld [vmem:[#allocation11 + $0x8] sm:$0xff] }
 0x1c6   : > { %684 = vmatpush.bf16.msra.mxu3 %v887_v37 }
 0x1ca   : > { %v553_v38 = vpop.f32.mrf.mxu3 }
 0x1cb   : > { %v984_v39 = vpop.eup %983  ;;  %v886_v38 = vld [vmem:[#allocation11] sm:$0xff] }
 0x1cc   : > { %v614_v40 = vpop.f32.mrf.mxu1  ;;  %v431_v41 = vsel %vm405_vm1, %v984_v39, 0.0  ;;  %685 = vmatpush.bf16.msra.mxu3 %v886_v38 }
 0x1cd   : > { %432 = vadd.xlane.f32.xlu1 %v431_v41  ;;  %v618_v42 = vsel %vm405_vm1, %v614_v40, -inf }
 0x1ce   : > { %619 = vmax.xlane.f32.xlu2 %v618_v42 }
 0x1d4   : > { %v616_v43 = vpop.f32.mrf.mxu1 }
 0x1d6   : > { %556 = vmax.xlane.f32.xlu2 %v555_v44 }
 0x1ee   : > { %504 = vrot.lane.b32.xlu2 %v503_v49, %s1232_s7 }
 0x231   : > { %v491_v51 = vpop.xlane.xlu0 %490 }
 0x232   : > { %v492_v52 = vsub.f32 %v485_v31, %v491_v51 }
 0x234   : > { %v493_v53 = vmul.f32 1.442695, %v492_v52 }
 0x236   : > { %985 = vpow2.f32 %v493_v53 }
 0x23c   : > { %v986_v54 = vpop.eup %985 }
 0x23d   : > { %v495_v55 = vsel %vm405_vm1, %v986_v54, 0.0 }
 0x23e   : > { %496 = vadd.xlane.f32.xlu0 %v495_v55 }
 0x240   : > { %v433_v56 = vpop.xlane.xlu1 %432 }
 0x241   : > { %987 = vrcp.f32 %v433_v56  ;;  %v620_v57 = vpop.xlane.xlu2 %619 }
 0x242   : > { %v621_v58 = vsub.f32 %v614_v40, %v620_v57 }
 0x244   : > { %v622_v59 = vmul.f32 1.442695, %v621_v58 }
 0x246   : > { %989 = vpow2.f32 %v622_v59 }
 0x247   : > { %v988_v60 = vpop.eup %987 }
 0x248   : > { %v435_v61 = vmul.f32 %v988_v60, %v984_v39 }
 0x249   : > { %v557_v62 = vpop.xlane.xlu2 %556 }
 0x24a   : > { %v558_v63 = vsub.f32 %v551_v35, %v557_v62  ;;  %v436_v0 = vpack.c.bf16 %v435_v61, %v435_v61 }
 0x24c   : > { %v990_v1 = vpop.eup %989  ;;  %v559_v2 = vmul.f32 1.442695, %v558_v63  ;;  %860 = vmatmul.msk.bf16.vlgmr.msrb.gmra.mxu0 %vm405_vm1, %v436_v0 }
 0x24d   : > { %v624_v3 = vsel %vm405_vm1, %v990_v1, 0.0 }
 0x24e   : > { %991 = vpow2.f32 %v559_v2  ;;  %625 = vadd.xlane.f32.xlu0 %v624_v3 }
 0x251   : > { %v505_v6 = vpop.permute.xlu2 %504 }
 0x252   : > { %v510_v7 = vsel %vm440_vm2, %v505_v6, 0 }
 0x253   : > { %519 = vmatpush.bf16.msrb.mxu2 %v510_v7 }
 0x254   : > { %v992_v4 = vpop.eup %991 }
 0x255   : > { %v561_v5 = vsel %vm405_vm1, %v992_v4, 0.0 }
 0x256   : > { %562 = vadd.xlane.f32.xlu1 %v561_v5 }
 0x262   : > { %630 = vrot.lane.b32.xlu0 %v503_v49, %s1233_s23 }
 0x26f   : > { %567 = vrot.lane.b32.xlu1 %v503_v49, %s1231_s26  ;;  %s1163_s26 = sshra.s32 %s708_s22, 4  ;;  %s1164_s26 = int_to_ptr.hbm [resolvable:$true] %s1163_s26 }
 0x270   : > { %s1165_s7 = scalar_lea.hbm %s1164_s26, 8  ;;  %p1170_p12 = scmp.lt.s32.totalorder %s1164_s26, %s1481_s5 }
 0x271   : > { %p1166_p1 = scmp.ne.s32.totalorder %s1164_s26, %s1165_s7 }
 0x273   : > { %p1167_p3 = pnand %p1166_p1, %p1354_p4 }
 0x275   : > { %p1168_p5 = pneg %p1167_p3 }
 0x2b1   : > { %v497_v8 = vpop.xlane.xlu0 %496 }
 0x2b2   : > { %993 = vrcp.f32 %v497_v8 }
 0x2b8   : > { %v994_v9 = vpop.eup %993 }
 0x2b9   : > { %v499_v10 = vmul.f32 %v994_v9, %v986_v54 }
 0x2bb   : > { %v500_v11 = vpack.c.bf16 %v499_v10, %v499_v10 }
 0x2bd   : > { %862 = vmatmul.msk.bf16.vlgmr.msrb.gmra.mxu2 %vm405_vm1, %v500_v11 }
 0x2c1   : > { %v626_v12 = vpop.xlane.xlu0 %625 }
 0x2c2   : > { %995 = vrcp.f32 %v626_v12 }
 0x2c8   : > { %v996_v15 = vpop.eup %995 }
 0x2c9   : > { %v453_v13 = vpop.f32.mrf.mxu0  ;;  %v628_v17 = vmul.f32 %v996_v15, %v990_v1  ;;  %v563_v18 = vpop.xlane.xlu1 %562 }
 0x2ca   : > { %v457_v14 = vpack.c.bf16 %v453_v13, %v453_v13  ;;  %997 = vrcp.f32 %v563_v18 }
 0x2cb   : > { %v629_v21 = vpack.c.bf16 %v628_v17, %v628_v17 }
 0x2cc   : > { %459 = vst.msk [vmem:[#allocation2] sm:$0xf] %vm458_vm3, %v457_v14 }
 0x2d0   : > { %v998_v22 = vpop.eup %997 }
 0x2d1   : > { %v455_v16 = vpop.f32.mrf.mxu0  ;;  %v565_v23 = vmul.f32 %v998_v22, %v992_v4 }
 0x2d3   : > { %v566_v26 = vpack.c.bf16 %v565_v23, %v565_v23 }
 0x2d4   : > { %v631_v19 = vpop.permute.xlu0 %630 }
 0x2d5   : > { %v636_v20 = vsel %vm440_vm2, %v631_v19, 0 }
 0x2d6   : > { %645 = vmatpush.bf16.msra.mxu2 %v636_v20 }
 0x2d9   : > { %866 = vmatmul.msk.bf16.vlgmr.msra.gmra.mxu2 %vm405_vm1, %v629_v21 }
 0x2e1   : > { %v568_v24 = vpop.permute.xlu1 %567 }
 0x2e2   : > { %v573_v25 = vsel %vm440_vm2, %v568_v24, 0 }
 0x2e3   : > { %582 = vmatpush.bf16.msra.mxu0 %v573_v25 }
 0x2e6   : > { %864 = vmatmul.msk.bf16.vlgmr.msra.gmra.mxu0 %vm405_vm1, %v566_v26 }
 0x340   : > { %v521_v27 = vpop.f32.mrf.mxu2 }
 0x341   : > { %v525_v28 = vpack.c.bf16 %v521_v27, %v521_v27 }
 0x343   : > { %527 = vrot.lane.b32.xlu2 %v525_v28, %s1234_s24  ;;  %s1169_s24 = scalar_lea.hbm %s1481_s5, 16 }
 0x344   : > { %p1171_p7 = scmp.lt.s32.totalorder %s1169_s24, %s1165_s7 }
 0x346   : > { %p1172_p8 = por %p1171_p7, %p1170_p12 }
 0x348   : > { %v523_v29 = vpop.f32.mrf.mxu2  ;;  %p1173_p9 = pnand %p1172_p8, %p1168_p5 }
 0x35c   : > { %v647_v30 = vpop.f32.mrf.mxu2 }
 0x35d   : > { %v651_v31 = vpack.c.bf16 %v647_v30, %v647_v30 }
 0x35f   : > { %653 = vrot.lane.b32.xlu2 %v651_v31, %s1235_s27 }
 0x363   : > { %v584_v32 = vpop.f32.mrf.mxu0 }
 0x364   : > { %v588_v33 = vpack.c.bf16 %v584_v32, %v584_v32  ;;  %v649_v34 = vpop.f32.mrf.mxu2 }
 0x366   : > { %590 = vrot.lane.b32.xlu0 %v588_v33, %s1236_s28 }
 0x36b   : > { %v586_v35 = vpop.f32.mrf.mxu0 }
 0x39d   : > { %v528_v36 = vpop.permute.xlu2 %527 }
 0x39e   : > { %531 = vst.msk [vmem:[#allocation2] sm:$0xf] %vm530_vm4, %v528_v36 }
 0x3b9   : > { %v654_v40 = vpop.permute.xlu2 %653 }
 0x3d8   : > { %v591_v39 = vpop.permute.xlu0 %590 }
 0x3d9   : > { %594 = vst.msk [vmem:[#allocation2] sm:$0xf] %vm593_vm5, %v591_v39 }
 0x3da   : > { %657 = vst.msk [vmem:[#allocation2] sm:$0xf] %vm656_vm6, %v654_v40 }
 0x3e1   : > { %v658_v41 = vld [vmem:[#allocation2] sm:$0xf] }
 0x3e2   : > { %875 = vmatmul.msk.bf16.vlgmr.msra.gmra.mxu3 %vm327_vm0, %v658_v41 }
 0x465   : > { %v687_v42 = vpop.f32.mrf.mxu3 }
 0x466   : > { %691 = vst.msk [vmem:[%s307_s16] sm:$0xff] %vm327_vm0, %v687_v42 }
 0x467   : > { %1176 = shalt.err (!%p1173_p9)
}
 0x468   : > { %906 = dma.vmem_to_hbm [thread:$0]  (%p1354_p4), %s706_s9, 128, %s708_s22, %s693_s30  }
 0x46d   : > { %v689_v43 = vpop.f32.mrf.mxu3 }
 0x46e PF: > { %s719_s10 = sand.u32 1, %s1211_s18   ;;  %p1489_p10 = scmp.ge.s32.totalorder %s1223_s21, 2 }
 0x46f   : > { %s720_s28 = scalar_lea.sflag [#allocation5], %s719_s10 }
 0x470   : > { %p926_p13 = pnand %p1489_p10, %p1358_p6 }
 0x472   : > { %p927_p11 = pneg %p926_p13 }
 0x474   : > { %1206 = dma.done.wait (%p927_p11), %s720_s28, 128  }
 0x475   : > { %1208 = vsyncadd (%p927_p11), %s720_s28, 4294967168  ;;  %p20_p0 = scmp.ge.s32.totalorder %s1328_s29, 4   ;;  %s1490_s18 = smov %s1215_s19 }
 0x476   : > { %s1491_s19 = smov %s1219_s20  ;;  %s1492_s20 = smov %s1339_s8 }
 0x477   : > { %s1493_s21 = smov %s1328_s29  ;;  %22 = sbr.rel (!%p20_p0) target bundleno = 7 (0x7), region = 101 }
 0x47c   :  { %726 = vsyncpa [#allocation4], 1 }
 0x47d   :  { %728 = vsyncpa [#allocation4 + $0x1], 1 }
 0x47e   :  { %729 = vsyncpa [#allocation7], 1 }
 0x47f   :  { %730 = vsyncpa [#allocation10], 1 }
 0x480   :  { %731 = vsyncpa [#allocation5], 1 }
 0x481   :  { %733 = vsyncpa [#allocation5 + $0x1], 1 }

</bundles_post_ra>
